<compile_context>
chip_gen: v7x
topology: tpu7x:2x2x1
jax: 0.10.0
libtpu: 0.0.40
codegen_flags: <defaults>
</compile_context>

<pallas_src>
import functools
import math

import jax
import jax.numpy as jnp
from jax import lax
from jax.experimental import pallas as pl
from jax.experimental.pallas import tpu as pltpu

# ----------------------------- model config (small, synthetic) ------------------------
ACTION_DIM = 4
STATE_DIM = 8
CHANNELS = ACTION_DIM + STATE_DIM
HORIZON = 8          # T (sequence length)
HIDDEN = 32          # transformer width
NUM_HEADS = 2
HEAD_DIM = HIDDEN // NUM_HEADS
MLP_DIM = 4 * HIDDEN
NUM_LAYERS = 2
LN_EPS = 1e-5


# ------------------------------- in-kernel helper math ---------------------------------
def _layernorm(x, g, b):
    mean = jnp.mean(x, axis=-1, keepdims=True)
    cent = x - mean
    var = jnp.mean(cent * cent, axis=-1, keepdims=True)
    return cent * lax.rsqrt(var + LN_EPS) * g + b


def _gelu_tanh(x):
    # TODO(synk): tanh-approx GELU; switch to erf if the reference diffuser uses exact GELU.
    return 0.5 * x * (1.0 + jnp.tanh(0.7978845608028654 * (x + 0.044715 * x * x * x)))


# ----------------------------------- fused Pallas kernel -------------------------------
def _fused_forward_kernel(
    # activations / embeddings
    x_ref, temb_ref,
    # global weights
    w_in_ref, b_in_ref,
    w_t1_ref, b_t1_ref, w_t2_ref, b_t2_ref,
    pos_ref,
    # per-layer weights, stacked on a leading layer axis
    ln1_g_ref, ln1_b_ref, wqkv_ref, bqkv_ref, wo_ref, bo_ref,
    ln2_g_ref, ln2_b_ref, w1_ref, b1_ref, w2_ref, b2_ref,
    # final LN + fused output heads
    ln_f_g_ref, ln_f_b_ref, w_head_ref, b_head_ref,
    # output
    out_ref,
    *, batch, horizon):
    f32 = jnp.float32
    B, T = batch, horizon
    scale = 1.0 / math.sqrt(HEAD_DIM)

    # --- token embedding: fused [actions|states] @ [w_action; w_state] -----------------
    x = jnp.dot(x_ref[...], w_in_ref[...], preferred_element_type=f32) + b_in_ref[...]

    # --- timestep MLP (SiLU) on the precomputed sinusoid (B, HIDDEN) --------------------
    t = jnp.dot(temb_ref[...], w_t1_ref[...], preferred_element_type=f32) + b_t1_ref[...]
    t = t * jax.nn.sigmoid(t)
    t = jnp.dot(t, w_t2_ref[...], preferred_element_type=f32) + b_t2_ref[...]       # (B, H)

    # --- add learned positional + time embeddings (rows ordered b*T + t) ----------------
    pos = pos_ref[...]                                                               # (T, H)
    pos_full = jnp.concatenate([pos] * B, axis=0)                                    # (B*T, H)
    t_full = jnp.concatenate(
        [jnp.broadcast_to(t[b:b + 1, :], (T, HIDDEN)) for b in range(B)], axis=0)    # (B*T, H)
    x = x + pos_full + t_full

    # --- transformer blocks (all weights / activations stay in VMEM) --------------------
    for l in range(NUM_LAYERS):
        # self-attention (pre-LN)
        h = _layernorm(x, ln1_g_ref[l], ln1_b_ref[l])
        qkv = jnp.dot(h, wqkv_ref[l], preferred_element_type=f32) + bqkv_ref[l]      # (BT, 3H)

        rows = []
        for b in range(B):
            r0, r1 = b * T, (b + 1) * T
            heads = []
            for hd in range(NUM_HEADS):
                c = hd * HEAD_DIM
                q = qkv[r0:r1, c:c + HEAD_DIM]                                       # (T, Dh)
                k = qkv[r0:r1, HIDDEN + c:HIDDEN + c + HEAD_DIM]
                v = qkv[r0:r1, 2 * HIDDEN + c:2 * HIDDEN + c + HEAD_DIM]
                # q @ k^T via dot_general (no explicit transpose)
                s = lax.dot_general(q, k, (((1,), (1,)), ((), ())),
                                    preferred_element_type=f32) * scale              # (T, T)
                s = s - jnp.max(s, axis=-1, keepdims=True)
                p = jnp.exp(s)
                p = p * pl.reciprocal(jnp.sum(p, axis=-1, keepdims=True), approx=True)
                heads.append(jnp.dot(p, v, preferred_element_type=f32))              # (T, Dh)
            rows.append(jnp.concatenate(heads, axis=1))                              # (T, H)
        a = jnp.concatenate(rows, axis=0)                                            # (BT, H)

        x = x + jnp.dot(a, wo_ref[l], preferred_element_type=f32) + bo_ref[l]

        # MLP (pre-LN, GELU)
        h = _layernorm(x, ln2_g_ref[l], ln2_b_ref[l])
        m = jnp.dot(h, w1_ref[l], preferred_element_type=f32) + b1_ref[l]
        m = _gelu_tanh(m)
        x = x + jnp.dot(m, w2_ref[l], preferred_element_type=f32) + b2_ref[l]

    # --- final LN + fused output heads: columns ordered [actions | states] --------------
    xf = _layernorm(x, ln_f_g_ref[...], ln_f_b_ref[...])
    out_ref[...] = (jnp.dot(xf, w_head_ref[...], preferred_element_type=f32)
                    + b_head_ref[...])


# --------------------------------- pallas_call wrapper ---------------------------------
def _full_spec(shape):
    # full-array block (last two dims equal the array dims -> satisfies tiling rule)
    return pl.BlockSpec(shape, lambda i, _s=shape: (0,) * len(_s))


def diffuser_policy_forward(packed, sample, timestep):
    """Mirrors DiffuserTransformerPolicy.forward exactly (channel-first in/out)."""
    if sample.shape[1] == CHANNELS:
        sample = jnp.transpose(sample, (0, 2, 1))            # (B, T, A+S)
    assert sample.shape[2] == CHANNELS
    B, T, C = sample.shape

    x_in = sample.reshape(B * T, C).astype(jnp.float32)      # rows ordered b*T + t

    # sinusoidal timestep table (tiny glue; the time-MLP runs inside the kernel)
    t = jnp.broadcast_to(jnp.asarray(timestep, jnp.float32).reshape(-1), (B,))
    half = HIDDEN // 2
    freqs = jnp.exp(-math.log(10000.0) * jnp.arange(half, dtype=jnp.float32) / half)
    args = t[:, None] * freqs[None, :]
    temb = jnp.concatenate([jnp.sin(args), jnp.cos(args)], axis=-1)   # (B, HIDDEN)

    kernel = functools.partial(_fused_forward_kernel, batch=B, horizon=T)

    in_arrays = [
        x_in, temb,
        packed["w_in"], packed["b_in"],
        packed["w_t1"], packed["b_t1"], packed["w_t2"], packed["b_t2"],
        packed["pos_emb"],
        packed["ln1_g"], packed["ln1_b"], packed["wqkv"], packed["bqkv"],
        packed["wo"], packed["bo"],
        packed["ln2_g"], packed["ln2_b"], packed["w1"], packed["b1"],
        packed["w2"], packed["b2"],
        packed["ln_f_g"], packed["ln_f_b"], packed["w_head"], packed["b_head"],
    ]

    out = pl.pallas_call(
        kernel,
        out_shape=jax.ShapeDtypeStruct((B * T, C), jnp.float32),
        grid=(1,),
        in_specs=[_full_spec(a.shape) for a in in_arrays],
        out_specs=_full_spec((B * T, C)),
        compiler_params=pltpu.CompilerParams(dimension_semantics=("arbitrary",)),
    )(*in_arrays)

    out = out.reshape(B, T, C)                                # [actions | states]
    out = jnp.transpose(out, (0, 2, 1))                       # (B, A+S, T)
    return {"sample": out}   # stand-in for DiffuserTransformerPolicyOutput


# ----------------------------------- parameter init ------------------------------------
def init_params(key):
    """Original (PyTorch-like) structured parameters: separate q/k/v, separate heads."""
    keys = list(jax.random.split(key, 64))
    kit = iter(keys)

    def w(shape, scale=0.02):
        return (scale * jax.random.normal(next(kit), shape)).astype(jnp.float32)

    zeros = lambda s: jnp.zeros(s, jnp.float32)
    ones = lambda s: jnp.ones(s, jnp.float32)

    params = {
        "w_state": w((STATE_DIM, HIDDEN)), "b_state": zeros((HIDDEN,)),
        "w_action": w((ACTION_DIM, HIDDEN)), "b_action": zeros((HIDDEN,)),
        "w_t1": w((HIDDEN, MLP_DIM)), "b_t1": zeros((MLP_DIM,)),
        "w_t2": w((MLP_DIM, HIDDEN)), "b_t2": zeros((HIDDEN,)),
        "pos_emb": w((HORIZON, HIDDEN)),
        "ln_f_g": ones((HIDDEN,)), "ln_f_b": zeros((HIDDEN,)),
        "w_out_s": w((HIDDEN, STATE_DIM)), "b_out_s": zeros((STATE_DIM,)),
        "w_out_a": w((HIDDEN, ACTION_DIM)), "b_out_a": zeros((ACTION_DIM,)),
        "layers": [],
    }
    for _ in range(NUM_LAYERS):
        params["layers"].append({
            "ln1_g": ones((HIDDEN,)), "ln1_b": zeros((HIDDEN,)),
            "wq": w((HIDDEN, HIDDEN)), "bq": zeros((HIDDEN,)),
            "wk": w((HIDDEN, HIDDEN)), "bk": zeros((HIDDEN,)),
            "wv": w((HIDDEN, HIDDEN)), "bv": zeros((HIDDEN,)),
            "wo": w((HIDDEN, HIDDEN)), "bo": zeros((HIDDEN,)),
            "ln2_g": ones((HIDDEN,)), "ln2_b": zeros((HIDDEN,)),
            "w1": w((HIDDEN, MLP_DIM)), "b1": zeros((MLP_DIM,)),
            "w2": w((MLP_DIM, HIDDEN)), "b2": zeros((HIDDEN,)),
        })
    return params


def pack_params(p):
    """One-time packing into the fused / layer-stacked layout used by the kernel."""
    L = p["layers"]
    packed = {
        # fused token embedding: rows [w_action ; w_state] to match [actions|states] input
        "w_in": jnp.concatenate([p["w_action"], p["w_state"]], axis=0),          # (C, H)
        "b_in": (p["b_action"] + p["b_state"]).reshape(1, HIDDEN),
        "w_t1": p["w_t1"], "b_t1": p["b_t1"].reshape(1, MLP_DIM),
        "w_t2": p["w_t2"], "b_t2": p["b_t2"].reshape(1, HIDDEN),
        "pos_emb": p["pos_emb"],
        "ln_f_g": p["ln_f_g"].reshape(1, HIDDEN),
        "ln_f_b": p["ln_f_b"].reshape(1, HIDDEN),
        # fused output heads: columns [w_out_a | w_out_s] -> cat([actions, states], -1)
        "w_head": jnp.concatenate([p["w_out_a"], p["w_out_s"]], axis=1),         # (H, C)
        "b_head": jnp.concatenate([p["b_out_a"], p["b_out_s"]]).reshape(1, CHANNELS),
        # per-layer weights stacked on a leading layer axis
        "ln1_g": jnp.stack([lp["ln1_g"].reshape(1, HIDDEN) for lp in L]),
        "ln1_b": jnp.stack([lp["ln1_b"].reshape(1, HIDDEN) for lp in L]),
        "wqkv": jnp.stack([jnp.concatenate([lp["wq"], lp["wk"], lp["wv"]], axis=1)
                           for lp in L]),                                        # (L, H, 3H)
        "bqkv": jnp.stack([jnp.concatenate([lp["bq"], lp["bk"], lp["bv"]]).reshape(1, 3 * HIDDEN)
                           for lp in L]),
        "wo": jnp.stack([lp["wo"] for lp in L]),
        "bo": jnp.stack([lp["bo"].reshape(1, HIDDEN) for lp in L]),
        "ln2_g": jnp.stack([lp["ln2_g"].reshape(1, HIDDEN) for lp in L]),
        "ln2_b": jnp.stack([lp["ln2_b"].reshape(1, HIDDEN) for lp in L]),
        "w1": jnp.stack([lp["w1"] for lp in L]),
        "b1": jnp.stack([lp["b1"].reshape(1, MLP_DIM) for lp in L]),
        "w2": jnp.stack([lp["w2"] for lp in L]),
        "b2": jnp.stack([lp["b2"].reshape(1, HIDDEN) for lp in L]),
    }
    return packed


# --------------------------------------- main ------------------------------------------
if __name__ == "__main__":
    key = jax.random.PRNGKey(0)
    pkey, xkey = jax.random.split(key)

    params = init_params(pkey)
    packed = pack_params(params)

    B = 2
    # channel-first sample, exactly like the PyTorch policy input: (B, A+S, T)
    sample = jax.random.normal(
        xkey, (B, ACTION_DIM + STATE_DIM, HORIZON), dtype=jnp.float32
    )
    timestep = jnp.array(7, dtype=jnp.int32)

    out = jax.jit(diffuser_policy_forward)(packed, sample, timestep)
    out_sample = jax.block_until_ready(out["sample"])

    assert out_sample.shape == (B, ACTION_DIM + STATE_DIM, HORIZON)
    assert out_sample.dtype == jnp.float32
    assert bool(jnp.all(jnp.isfinite(out_sample)))
    print("KERNEL_OK")
</pallas_src>

<mosaic_0001>
module attributes {stable_mosaic.version = 11 : i64} {
  func.func @_fused_forward_kernel(%arg0: i32, %arg1: memref<16x12xf32, #tpu.memory_space<vmem>>, %arg2: memref<2x32xf32, #tpu.memory_space<vmem>>, %arg3: memref<12x32xf32, #tpu.memory_space<vmem>>, %arg4: memref<1x32xf32, #tpu.memory_space<vmem>>, %arg5: memref<32x128xf32, #tpu.memory_space<vmem>>, %arg6: memref<1x128xf32, #tpu.memory_space<vmem>>, %arg7: memref<128x32xf32, #tpu.memory_space<vmem>>, %arg8: memref<1x32xf32, #tpu.memory_space<vmem>>, %arg9: memref<8x32xf32, #tpu.memory_space<vmem>>, %arg10: memref<2x1x32xf32, #tpu.memory_space<vmem>>, %arg11: memref<2x1x32xf32, #tpu.memory_space<vmem>>, %arg12: memref<2x32x96xf32, #tpu.memory_space<vmem>>, %arg13: memref<2x1x96xf32, #tpu.memory_space<vmem>>, %arg14: memref<2x32x32xf32, #tpu.memory_space<vmem>>, %arg15: memref<2x1x32xf32, #tpu.memory_space<vmem>>, %arg16: memref<2x1x32xf32, #tpu.memory_space<vmem>>, %arg17: memref<2x1x32xf32, #tpu.memory_space<vmem>>, %arg18: memref<2x32x128xf32, #tpu.memory_space<vmem>>, %arg19: memref<2x1x128xf32, #tpu.memory_space<vmem>>, %arg20: memref<2x128x32xf32, #tpu.memory_space<vmem>>, %arg21: memref<2x1x32xf32, #tpu.memory_space<vmem>>, %arg22: memref<1x32xf32, #tpu.memory_space<vmem>>, %arg23: memref<1x32xf32, #tpu.memory_space<vmem>>, %arg24: memref<32x12xf32, #tpu.memory_space<vmem>>, %arg25: memref<1x12xf32, #tpu.memory_space<vmem>>, %arg26: memref<16x12xf32, #tpu.memory_space<vmem>>) attributes {dimension_semantics = [#tpu.dimension_semantics<arbitrary>], iteration_bounds = array<i64: 1>, scalar_prefetch = 0 : i64, scratch_operands = 0 : i64, tpu.core_type = #tpu.core_type<tc>, window_params = [{pipeline_mode = #tpu.pipeline_mode<synchronous>, transform_indices = @transform_0, window_bounds = array<i64: 16, 12>}, {pipeline_mode = #tpu.pipeline_mode<synchronous>, transform_indices = @transform_1, window_bounds = array<i64: 2, 32>}, {pipeline_mode = #tpu.pipeline_mode<synchronous>, transform_indices = @transform_2, window_bounds = array<i64: 12, 32>}, {pipeline_mode = #tpu.pipeline_mode<synchronous>, transform_indices = @transform_3, window_bounds = array<i64: 1, 32>}, {pipeline_mode = #tpu.pipeline_mode<synchronous>, transform_indices = @transform_4, window_bounds = array<i64: 32, 128>}, {pipeline_mode = #tpu.pipeline_mode<synchronous>, transform_indices = @transform_5, window_bounds = array<i64: 1, 128>}, {pipeline_mode = #tpu.pipeline_mode<synchronous>, transform_indices = @transform_6, window_bounds = array<i64: 128, 32>}, {pipeline_mode = #tpu.pipeline_mode<synchronous>, transform_indices = @transform_7, window_bounds = array<i64: 1, 32>}, {pipeline_mode = #tpu.pipeline_mode<synchronous>, transform_indices = @transform_8, window_bounds = array<i64: 8, 32>}, {pipeline_mode = #tpu.pipeline_mode<synchronous>, transform_indices = @transform_9, window_bounds = array<i64: 2, 1, 32>}, {pipeline_mode = #tpu.pipeline_mode<synchronous>, transform_indices = @transform_10, window_bounds = array<i64: 2, 1, 32>}, {pipeline_mode = #tpu.pipeline_mode<synchronous>, transform_indices = @transform_11, window_bounds = array<i64: 2, 32, 96>}, {pipeline_mode = #tpu.pipeline_mode<synchronous>, transform_indices = @transform_12, window_bounds = array<i64: 2, 1, 96>}, {pipeline_mode = #tpu.pipeline_mode<synchronous>, transform_indices = @transform_13, window_bounds = array<i64: 2, 32, 32>}, {pipeline_mode = #tpu.pipeline_mode<synchronous>, transform_indices = @transform_14, window_bounds = array<i64: 2, 1, 32>}, {pipeline_mode = #tpu.pipeline_mode<synchronous>, transform_indices = @transform_15, window_bounds = array<i64: 2, 1, 32>}, {pipeline_mode = #tpu.pipeline_mode<synchronous>, transform_indices = @transform_16, window_bounds = array<i64: 2, 1, 32>}, {pipeline_mode = #tpu.pipeline_mode<synchronous>, transform_indices = @transform_17, window_bounds = array<i64: 2, 32, 128>}, {pipeline_mode = #tpu.pipeline_mode<synchronous>, transform_indices = @transform_18, window_bounds = array<i64: 2, 1, 128>}, {pipeline_mode = #tpu.pipeline_mode<synchronous>, transform_indices = @transform_19, window_bounds = array<i64: 2, 128, 32>}, {pipeline_mode = #tpu.pipeline_mode<synchronous>, transform_indices = @transform_20, window_bounds = array<i64: 2, 1, 32>}, {pipeline_mode = #tpu.pipeline_mode<synchronous>, transform_indices = @transform_21, window_bounds = array<i64: 1, 32>}, {pipeline_mode = #tpu.pipeline_mode<synchronous>, transform_indices = @transform_22, window_bounds = array<i64: 1, 32>}, {pipeline_mode = #tpu.pipeline_mode<synchronous>, transform_indices = @transform_23, window_bounds = array<i64: 32, 12>}, {pipeline_mode = #tpu.pipeline_mode<synchronous>, transform_indices = @transform_24, window_bounds = array<i64: 1, 12>}, {pipeline_mode = #tpu.pipeline_mode<synchronous>, transform_indices = @transform_25, window_bounds = array<i64: 16, 12>}]} {
    %c0 = arith.constant 0 : index
    %c0_0 = arith.constant 0 : index
    %0 = vector.load %arg1[%c0, %c0_0] : memref<16x12xf32, #tpu.memory_space<vmem>>, vector<16x12xf32>
    %c0_1 = arith.constant 0 : index
    %c0_2 = arith.constant 0 : index
    %1 = vector.load %arg3[%c0_1, %c0_2] : memref<12x32xf32, #tpu.memory_space<vmem>>, vector<12x32xf32>
    %cst = arith.constant dense<0.000000e+00> : vector<16x32xf32>
    %2 = tpu.matmul %0, %1, %cst {dimension_numbers = #tpu.dot_dimension_numbers<[1], [0], [0], [1], [0, 0, 1, 1], [], []>} : vector<16x12xf32>, vector<12x32xf32>, vector<16x32xf32> -> vector<16x32xf32>
    %c0_3 = arith.constant 0 : index
    %c0_4 = arith.constant 0 : index
    %3 = vector.load %arg4[%c0_3, %c0_4] : memref<1x32xf32, #tpu.memory_space<vmem>>, vector<1x32xf32>
    %4 = vector.broadcast %3 : vector<1x32xf32> to vector<16x32xf32>
    %5 = arith.addf %2, %4 : vector<16x32xf32>
    %c0_5 = arith.constant 0 : index
    %c0_6 = arith.constant 0 : index
    %6 = vector.load %arg2[%c0_5, %c0_6] : memref<2x32xf32, #tpu.memory_space<vmem>>, vector<2x32xf32>
    %c0_7 = arith.constant 0 : index
    %c0_8 = arith.constant 0 : index
    %7 = vector.load %arg5[%c0_7, %c0_8] : memref<32x128xf32, #tpu.memory_space<vmem>>, vector<32x128xf32>
    %cst_9 = arith.constant dense<0.000000e+00> : vector<2x128xf32>
    %8 = tpu.matmul %6, %7, %cst_9 {dimension_numbers = #tpu.dot_dimension_numbers<[1], [0], [0], [1], [0, 0, 1, 1], [], []>} : vector<2x32xf32>, vector<32x128xf32>, vector<2x128xf32> -> vector<2x128xf32>
    %c0_10 = arith.constant 0 : index
    %c0_11 = arith.constant 0 : index
    %9 = vector.load %arg6[%c0_10, %c0_11] : memref<1x128xf32, #tpu.memory_space<vmem>>, vector<1x128xf32>
    %10 = vector.broadcast %9 : vector<1x128xf32> to vector<2x128xf32>
    %11 = arith.addf %8, %10 : vector<2x128xf32>
    %12 = arith.negf %11 : vector<2x128xf32>
    %13 = math.exp %12 : vector<2x128xf32>
    %cst_12 = arith.constant 1.000000e+00 : f32
    %14 = vector.broadcast %cst_12 : f32 to vector<2x128xf32>
    %15 = arith.addf %14, %13 : vector<2x128xf32>
    %16 = arith.divf %14, %15 : vector<2x128xf32>
    %17 = arith.mulf %11, %16 : vector<2x128xf32>
    %c0_13 = arith.constant 0 : index
    %c0_14 = arith.constant 0 : index
    %18 = vector.load %arg7[%c0_13, %c0_14] : memref<128x32xf32, #tpu.memory_space<vmem>>, vector<128x32xf32>
    %cst_15 = arith.constant dense<0.000000e+00> : vector<2x32xf32>
    %19 = tpu.matmul %17, %18, %cst_15 {dimension_numbers = #tpu.dot_dimension_numbers<[1], [0], [0], [1], [0, 0, 1, 1], [], []>} : vector<2x128xf32>, vector<128x32xf32>, vector<2x32xf32> -> vector<2x32xf32>
    %c0_16 = arith.constant 0 : index
    %c0_17 = arith.constant 0 : index
    %20 = vector.load %arg8[%c0_16, %c0_17] : memref<1x32xf32, #tpu.memory_space<vmem>>, vector<1x32xf32>
    %21 = vector.broadcast %20 : vector<1x32xf32> to vector<2x32xf32>
    %22 = arith.addf %19, %21 : vector<2x32xf32>
    %c0_18 = arith.constant 0 : index
    %c0_19 = arith.constant 0 : index
    %23 = vector.load %arg9[%c0_18, %c0_19] : memref<8x32xf32, #tpu.memory_space<vmem>>, vector<8x32xf32>
    %24 = tpu.concatenate %23, %23 in 0 : vector<8x32xf32>, vector<8x32xf32> -> vector<16x32xf32>
    %25 = vector.extract_strided_slice %22 {offsets = [0, 0], sizes = [1, 32], strides = [1, 1]} : vector<2x32xf32> to vector<1x32xf32>
    %26 = vector.shape_cast %25 : vector<1x32xf32> to vector<1x32xf32>
    %27 = vector.broadcast %26 : vector<1x32xf32> to vector<8x32xf32>
    %28 = vector.extract_strided_slice %22 {offsets = [1, 0], sizes = [1, 32], strides = [1, 1]} : vector<2x32xf32> to vector<1x32xf32>
    %29 = vector.shape_cast %28 : vector<1x32xf32> to vector<1x32xf32>
    %30 = vector.broadcast %29 : vector<1x32xf32> to vector<8x32xf32>
    %31 = tpu.concatenate %27, %30 in 0 : vector<8x32xf32>, vector<8x32xf32> -> vector<16x32xf32>
    %32 = arith.addf %5, %24 : vector<16x32xf32>
    %33 = arith.addf %32, %31 : vector<16x32xf32>
    %c0_20 = arith.constant 0 : index
    %c0_21 = arith.constant 0 : index
    %c0_22 = arith.constant 0 : index
    %34 = vector.load %arg10[%c0_20, %c0_21, %c0_22] : memref<2x1x32xf32, #tpu.memory_space<vmem>>, vector<1x1x32xf32>
    %35 = vector.shape_cast %34 : vector<1x1x32xf32> to vector<1x32xf32>
    %c0_23 = arith.constant 0 : index
    %c0_24 = arith.constant 0 : index
    %c0_25 = arith.constant 0 : index
    %36 = vector.load %arg11[%c0_23, %c0_24, %c0_25] : memref<2x1x32xf32, #tpu.memory_space<vmem>>, vector<1x1x32xf32>
    %37 = vector.shape_cast %36 : vector<1x1x32xf32> to vector<1x32xf32>
    %cst_26 = arith.constant dense<0.000000e+00> : vector<16xf32>
    %38 = vector.multi_reduction <add>, %33, %cst_26 [1] : vector<16x32xf32> to vector<16xf32>
    %39 = vector.shape_cast %38 : vector<16xf32> to vector<16x1xf32>
    %cst_27 = arith.constant 3.200000e+01 : f32
    %40 = vector.broadcast %cst_27 : f32 to vector<16x1xf32>
    %41 = arith.divf %39, %40 : vector<16x1xf32>
    %42 = vector.broadcast %41 : vector<16x1xf32> to vector<16x32xf32>
    %43 = arith.subf %33, %42 : vector<16x32xf32>
    %44 = arith.mulf %43, %43 : vector<16x32xf32>
    %cst_28 = arith.constant dense<0.000000e+00> : vector<16xf32>
    %45 = vector.multi_reduction <add>, %44, %cst_28 [1] : vector<16x32xf32> to vector<16xf32>
    %46 = vector.shape_cast %45 : vector<16xf32> to vector<16x1xf32>
    %cst_29 = arith.constant 3.200000e+01 : f32
    %47 = vector.broadcast %cst_29 : f32 to vector<16x1xf32>
    %48 = arith.divf %46, %47 : vector<16x1xf32>
    %cst_30 = arith.constant 9.99999974E-6 : f32
    %49 = vector.broadcast %cst_30 : f32 to vector<16x1xf32>
    %50 = arith.addf %48, %49 : vector<16x1xf32>
    %51 = math.rsqrt %50 : vector<16x1xf32>
    %52 = vector.broadcast %51 : vector<16x1xf32> to vector<16x32xf32>
    %53 = arith.mulf %43, %52 : vector<16x32xf32>
    %54 = vector.broadcast %35 : vector<1x32xf32> to vector<16x32xf32>
    %55 = arith.mulf %53, %54 : vector<16x32xf32>
    %56 = vector.broadcast %37 : vector<1x32xf32> to vector<16x32xf32>
    %57 = arith.addf %55, %56 : vector<16x32xf32>
    %c0_31 = arith.constant 0 : index
    %c0_32 = arith.constant 0 : index
    %c0_33 = arith.constant 0 : index
    %58 = vector.load %arg12[%c0_31, %c0_32, %c0_33] : memref<2x32x96xf32, #tpu.memory_space<vmem>>, vector<1x32x96xf32>
    %59 = vector.shape_cast %58 : vector<1x32x96xf32> to vector<32x96xf32>
    %cst_34 = arith.constant dense<0.000000e+00> : vector<16x96xf32>
    %60 = tpu.matmul %57, %59, %cst_34 {dimension_numbers = #tpu.dot_dimension_numbers<[1], [0], [0], [1], [0, 0, 1, 1], [], []>} : vector<16x32xf32>, vector<32x96xf32>, vector<16x96xf32> -> vector<16x96xf32>
    %c0_35 = arith.constant 0 : index
    %c0_36 = arith.constant 0 : index
    %c0_37 = arith.constant 0 : index
    %61 = vector.load %arg13[%c0_35, %c0_36, %c0_37] : memref<2x1x96xf32, #tpu.memory_space<vmem>>, vector<1x1x96xf32>
    %62 = vector.shape_cast %61 : vector<1x1x96xf32> to vector<1x96xf32>
    %63 = vector.broadcast %62 : vector<1x96xf32> to vector<16x96xf32>
    %64 = arith.addf %60, %63 : vector<16x96xf32>
    %65 = vector.extract_strided_slice %64 {offsets = [0, 0], sizes = [8, 16], strides = [1, 1]} : vector<16x96xf32> to vector<8x16xf32>
    %66 = vector.extract_strided_slice %64 {offsets = [0, 32], sizes = [8, 16], strides = [1, 1]} : vector<16x96xf32> to vector<8x16xf32>
    %67 = vector.extract_strided_slice %64 {offsets = [0, 64], sizes = [8, 16], strides = [1, 1]} : vector<16x96xf32> to vector<8x16xf32>
    %cst_38 = arith.constant dense<0.000000e+00> : vector<8x8xf32>
    %68 = tpu.matmul %65, %66, %cst_38 {dimension_numbers = #tpu.dot_dimension_numbers<[1], [1], [0], [0], [0, 0, 1, 0], [], []>} : vector<8x16xf32>, vector<8x16xf32>, vector<8x8xf32> -> vector<8x8xf32>
    %cst_39 = arith.constant 2.500000e-01 : f32
    %69 = vector.broadcast %cst_39 : f32 to vector<8x8xf32>
    %70 = arith.mulf %68, %69 : vector<8x8xf32>
    %cst_40 = arith.constant dense<0xFF800000> : vector<8xf32>
    %71 = vector.multi_reduction <maximumf>, %70, %cst_40 [1] : vector<8x8xf32> to vector<8xf32>
    %72 = vector.shape_cast %71 : vector<8xf32> to vector<8x1xf32>
    %73 = vector.broadcast %72 : vector<8x1xf32> to vector<8x8xf32>
    %74 = arith.subf %70, %73 : vector<8x8xf32>
    %75 = math.exp %74 : vector<8x8xf32>
    %cst_41 = arith.constant dense<0.000000e+00> : vector<8xf32>
    %76 = vector.multi_reduction <add>, %75, %cst_41 [1] : vector<8x8xf32> to vector<8xf32>
    %77 = vector.shape_cast %76 : vector<8xf32> to vector<8x1xf32>
    %78 = tpu.reciprocal %77 {approx = true} : vector<8x1xf32> -> vector<8x1xf32>
    %79 = vector.broadcast %78 : vector<8x1xf32> to vector<8x8xf32>
    %80 = arith.mulf %75, %79 : vector<8x8xf32>
    %cst_42 = arith.constant dense<0.000000e+00> : vector<8x16xf32>
    %81 = tpu.matmul %80, %67, %cst_42 {dimension_numbers = #tpu.dot_dimension_numbers<[1], [0], [0], [1], [0, 0, 1, 1], [], []>} : vector<8x8xf32>, vector<8x16xf32>, vector<8x16xf32> -> vector<8x16xf32>
    %82 = vector.extract_strided_slice %64 {offsets = [0, 16], sizes = [8, 16], strides = [1, 1]} : vector<16x96xf32> to vector<8x16xf32>
    %83 = vector.extract_strided_slice %64 {offsets = [0, 48], sizes = [8, 16], strides = [1, 1]} : vector<16x96xf32> to vector<8x16xf32>
    %84 = vector.extract_strided_slice %64 {offsets = [0, 80], sizes = [8, 16], strides = [1, 1]} : vector<16x96xf32> to vector<8x16xf32>
    %cst_43 = arith.constant dense<0.000000e+00> : vector<8x8xf32>
    %85 = tpu.matmul %82, %83, %cst_43 {dimension_numbers = #tpu.dot_dimension_numbers<[1], [1], [0], [0], [0, 0, 1, 0], [], []>} : vector<8x16xf32>, vector<8x16xf32>, vector<8x8xf32> -> vector<8x8xf32>
    %cst_44 = arith.constant 2.500000e-01 : f32
    %86 = vector.broadcast %cst_44 : f32 to vector<8x8xf32>
    %87 = arith.mulf %85, %86 : vector<8x8xf32>
    %cst_45 = arith.constant dense<0xFF800000> : vector<8xf32>
    %88 = vector.multi_reduction <maximumf>, %87, %cst_45 [1] : vector<8x8xf32> to vector<8xf32>
    %89 = vector.shape_cast %88 : vector<8xf32> to vector<8x1xf32>
    %90 = vector.broadcast %89 : vector<8x1xf32> to vector<8x8xf32>
    %91 = arith.subf %87, %90 : vector<8x8xf32>
    %92 = math.exp %91 : vector<8x8xf32>
    %cst_46 = arith.constant dense<0.000000e+00> : vector<8xf32>
    %93 = vector.multi_reduction <add>, %92, %cst_46 [1] : vector<8x8xf32> to vector<8xf32>
    %94 = vector.shape_cast %93 : vector<8xf32> to vector<8x1xf32>
    %95 = tpu.reciprocal %94 {approx = true} : vector<8x1xf32> -> vector<8x1xf32>
    %96 = vector.broadcast %95 : vector<8x1xf32> to vector<8x8xf32>
    %97 = arith.mulf %92, %96 : vector<8x8xf32>
    %cst_47 = arith.constant dense<0.000000e+00> : vector<8x16xf32>
    %98 = tpu.matmul %97, %84, %cst_47 {dimension_numbers = #tpu.dot_dimension_numbers<[1], [0], [0], [1], [0, 0, 1, 1], [], []>} : vector<8x8xf32>, vector<8x16xf32>, vector<8x16xf32> -> vector<8x16xf32>
    %99 = tpu.concatenate %81, %98 in 1 : vector<8x16xf32>, vector<8x16xf32> -> vector<8x32xf32>
    %100 = vector.extract_strided_slice %64 {offsets = [8, 0], sizes = [8, 16], strides = [1, 1]} : vector<16x96xf32> to vector<8x16xf32>
    %101 = vector.extract_strided_slice %64 {offsets = [8, 32], sizes = [8, 16], strides = [1, 1]} : vector<16x96xf32> to vector<8x16xf32>
    %102 = vector.extract_strided_slice %64 {offsets = [8, 64], sizes = [8, 16], strides = [1, 1]} : vector<16x96xf32> to vector<8x16xf32>
    %cst_48 = arith.constant dense<0.000000e+00> : vector<8x8xf32>
    %103 = tpu.matmul %100, %101, %cst_48 {dimension_numbers = #tpu.dot_dimension_numbers<[1], [1], [0], [0], [0, 0, 1, 0], [], []>} : vector<8x16xf32>, vector<8x16xf32>, vector<8x8xf32> -> vector<8x8xf32>
    %cst_49 = arith.constant 2.500000e-01 : f32
    %104 = vector.broadcast %cst_49 : f32 to vector<8x8xf32>
    %105 = arith.mulf %103, %104 : vector<8x8xf32>
    %cst_50 = arith.constant dense<0xFF800000> : vector<8xf32>
    %106 = vector.multi_reduction <maximumf>, %105, %cst_50 [1] : vector<8x8xf32> to vector<8xf32>
    %107 = vector.shape_cast %106 : vector<8xf32> to vector<8x1xf32>
    %108 = vector.broadcast %107 : vector<8x1xf32> to vector<8x8xf32>
    %109 = arith.subf %105, %108 : vector<8x8xf32>
    %110 = math.exp %109 : vector<8x8xf32>
    %cst_51 = arith.constant dense<0.000000e+00> : vector<8xf32>
    %111 = vector.multi_reduction <add>, %110, %cst_51 [1] : vector<8x8xf32> to vector<8xf32>
    %112 = vector.shape_cast %111 : vector<8xf32> to vector<8x1xf32>
    %113 = tpu.reciprocal %112 {approx = true} : vector<8x1xf32> -> vector<8x1xf32>
    %114 = vector.broadcast %113 : vector<8x1xf32> to vector<8x8xf32>
    %115 = arith.mulf %110, %114 : vector<8x8xf32>
    %cst_52 = arith.constant dense<0.000000e+00> : vector<8x16xf32>
    %116 = tpu.matmul %115, %102, %cst_52 {dimension_numbers = #tpu.dot_dimension_numbers<[1], [0], [0], [1], [0, 0, 1, 1], [], []>} : vector<8x8xf32>, vector<8x16xf32>, vector<8x16xf32> -> vector<8x16xf32>
    %117 = vector.extract_strided_slice %64 {offsets = [8, 16], sizes = [8, 16], strides = [1, 1]} : vector<16x96xf32> to vector<8x16xf32>
    %118 = vector.extract_strided_slice %64 {offsets = [8, 48], sizes = [8, 16], strides = [1, 1]} : vector<16x96xf32> to vector<8x16xf32>
    %119 = vector.extract_strided_slice %64 {offsets = [8, 80], sizes = [8, 16], strides = [1, 1]} : vector<16x96xf32> to vector<8x16xf32>
    %cst_53 = arith.constant dense<0.000000e+00> : vector<8x8xf32>
    %120 = tpu.matmul %117, %118, %cst_53 {dimension_numbers = #tpu.dot_dimension_numbers<[1], [1], [0], [0], [0, 0, 1, 0], [], []>} : vector<8x16xf32>, vector<8x16xf32>, vector<8x8xf32> -> vector<8x8xf32>
    %cst_54 = arith.constant 2.500000e-01 : f32
    %121 = vector.broadcast %cst_54 : f32 to vector<8x8xf32>
    %122 = arith.mulf %120, %121 : vector<8x8xf32>
    %cst_55 = arith.constant dense<0xFF800000> : vector<8xf32>
    %123 = vector.multi_reduction <maximumf>, %122, %cst_55 [1] : vector<8x8xf32> to vector<8xf32>
    %124 = vector.shape_cast %123 : vector<8xf32> to vector<8x1xf32>
    %125 = vector.broadcast %124 : vector<8x1xf32> to vector<8x8xf32>
    %126 = arith.subf %122, %125 : vector<8x8xf32>
    %127 = math.exp %126 : vector<8x8xf32>
    %cst_56 = arith.constant dense<0.000000e+00> : vector<8xf32>
    %128 = vector.multi_reduction <add>, %127, %cst_56 [1] : vector<8x8xf32> to vector<8xf32>
    %129 = vector.shape_cast %128 : vector<8xf32> to vector<8x1xf32>
    %130 = tpu.reciprocal %129 {approx = true} : vector<8x1xf32> -> vector<8x1xf32>
    %131 = vector.broadcast %130 : vector<8x1xf32> to vector<8x8xf32>
    %132 = arith.mulf %127, %131 : vector<8x8xf32>
    %cst_57 = arith.constant dense<0.000000e+00> : vector<8x16xf32>
    %133 = tpu.matmul %132, %119, %cst_57 {dimension_numbers = #tpu.dot_dimension_numbers<[1], [0], [0], [1], [0, 0, 1, 1], [], []>} : vector<8x8xf32>, vector<8x16xf32>, vector<8x16xf32> -> vector<8x16xf32>
    %134 = tpu.concatenate %116, %133 in 1 : vector<8x16xf32>, vector<8x16xf32> -> vector<8x32xf32>
    %135 = tpu.concatenate %99, %134 in 0 : vector<8x32xf32>, vector<8x32xf32> -> vector<16x32xf32>
    %c0_58 = arith.constant 0 : index
    %c0_59 = arith.constant 0 : index
    %c0_60 = arith.constant 0 : index
    %136 = vector.load %arg14[%c0_58, %c0_59, %c0_60] : memref<2x32x32xf32, #tpu.memory_space<vmem>>, vector<1x32x32xf32>
    %137 = vector.shape_cast %136 : vector<1x32x32xf32> to vector<32x32xf32>
    %cst_61 = arith.constant dense<0.000000e+00> : vector<16x32xf32>
    %138 = tpu.matmul %135, %137, %cst_61 {dimension_numbers = #tpu.dot_dimension_numbers<[1], [0], [0], [1], [0, 0, 1, 1], [], []>} : vector<16x32xf32>, vector<32x32xf32>, vector<16x32xf32> -> vector<16x32xf32>
    %139 = arith.addf %33, %138 : vector<16x32xf32>
    %c0_62 = arith.constant 0 : index
    %c0_63 = arith.constant 0 : index
    %c0_64 = arith.constant 0 : index
    %140 = vector.load %arg15[%c0_62, %c0_63, %c0_64] : memref<2x1x32xf32, #tpu.memory_space<vmem>>, vector<1x1x32xf32>
    %141 = vector.shape_cast %140 : vector<1x1x32xf32> to vector<1x32xf32>
    %142 = vector.broadcast %141 : vector<1x32xf32> to vector<16x32xf32>
    %143 = arith.addf %139, %142 : vector<16x32xf32>
    %c0_65 = arith.constant 0 : index
    %c0_66 = arith.constant 0 : index
    %c0_67 = arith.constant 0 : index
    %144 = vector.load %arg16[%c0_65, %c0_66, %c0_67] : memref<2x1x32xf32, #tpu.memory_space<vmem>>, vector<1x1x32xf32>
    %145 = vector.shape_cast %144 : vector<1x1x32xf32> to vector<1x32xf32>
    %c0_68 = arith.constant 0 : index
    %c0_69 = arith.constant 0 : index
    %c0_70 = arith.constant 0 : index
    %146 = vector.load %arg17[%c0_68, %c0_69, %c0_70] : memref<2x1x32xf32, #tpu.memory_space<vmem>>, vector<1x1x32xf32>
    %147 = vector.shape_cast %146 : vector<1x1x32xf32> to vector<1x32xf32>
    %cst_71 = arith.constant dense<0.000000e+00> : vector<16xf32>
    %148 = vector.multi_reduction <add>, %143, %cst_71 [1] : vector<16x32xf32> to vector<16xf32>
    %149 = vector.shape_cast %148 : vector<16xf32> to vector<16x1xf32>
    %cst_72 = arith.constant 3.200000e+01 : f32
    %150 = vector.broadcast %cst_72 : f32 to vector<16x1xf32>
    %151 = arith.divf %149, %150 : vector<16x1xf32>
    %152 = vector.broadcast %151 : vector<16x1xf32> to vector<16x32xf32>
    %153 = arith.subf %143, %152 : vector<16x32xf32>
    %154 = arith.mulf %153, %153 : vector<16x32xf32>
    %cst_73 = arith.constant dense<0.000000e+00> : vector<16xf32>
    %155 = vector.multi_reduction <add>, %154, %cst_73 [1] : vector<16x32xf32> to vector<16xf32>
    %156 = vector.shape_cast %155 : vector<16xf32> to vector<16x1xf32>
    %cst_74 = arith.constant 3.200000e+01 : f32
    %157 = vector.broadcast %cst_74 : f32 to vector<16x1xf32>
    %158 = arith.divf %156, %157 : vector<16x1xf32>
    %cst_75 = arith.constant 9.99999974E-6 : f32
    %159 = vector.broadcast %cst_75 : f32 to vector<16x1xf32>
    %160 = arith.addf %158, %159 : vector<16x1xf32>
    %161 = math.rsqrt %160 : vector<16x1xf32>
    %162 = vector.broadcast %161 : vector<16x1xf32> to vector<16x32xf32>
    %163 = arith.mulf %153, %162 : vector<16x32xf32>
    %164 = vector.broadcast %145 : vector<1x32xf32> to vector<16x32xf32>
    %165 = arith.mulf %163, %164 : vector<16x32xf32>
    %166 = vector.broadcast %147 : vector<1x32xf32> to vector<16x32xf32>
    %167 = arith.addf %165, %166 : vector<16x32xf32>
    %c0_76 = arith.constant 0 : index
    %c0_77 = arith.constant 0 : index
    %c0_78 = arith.constant 0 : index
    %168 = vector.load %arg18[%c0_76, %c0_77, %c0_78] : memref<2x32x128xf32, #tpu.memory_space<vmem>>, vector<1x32x128xf32>
    %169 = vector.shape_cast %168 : vector<1x32x128xf32> to vector<32x128xf32>
    %cst_79 = arith.constant dense<0.000000e+00> : vector<16x128xf32>
    %170 = tpu.matmul %167, %169, %cst_79 {dimension_numbers = #tpu.dot_dimension_numbers<[1], [0], [0], [1], [0, 0, 1, 1], [], []>} : vector<16x32xf32>, vector<32x128xf32>, vector<16x128xf32> -> vector<16x128xf32>
    %c0_80 = arith.constant 0 : index
    %c0_81 = arith.constant 0 : index
    %c0_82 = arith.constant 0 : index
    %171 = vector.load %arg19[%c0_80, %c0_81, %c0_82] : memref<2x1x128xf32, #tpu.memory_space<vmem>>, vector<1x1x128xf32>
    %172 = vector.shape_cast %171 : vector<1x1x128xf32> to vector<1x128xf32>
    %173 = vector.broadcast %172 : vector<1x128xf32> to vector<16x128xf32>
    %174 = arith.addf %170, %173 : vector<16x128xf32>
    %cst_83 = arith.constant 5.000000e-01 : f32
    %175 = vector.broadcast %cst_83 : f32 to vector<16x128xf32>
    %176 = arith.mulf %175, %174 : vector<16x128xf32>
    %cst_84 = arith.constant 4.471500e-02 : f32
    %177 = vector.broadcast %cst_84 : f32 to vector<16x128xf32>
    %178 = arith.mulf %177, %174 : vector<16x128xf32>
    %179 = arith.mulf %178, %174 : vector<16x128xf32>
    %180 = arith.mulf %179, %174 : vector<16x128xf32>
    %181 = arith.addf %174, %180 : vector<16x128xf32>
    %cst_85 = arith.constant 0.797884583 : f32
    %182 = vector.broadcast %cst_85 : f32 to vector<16x128xf32>
    %183 = arith.mulf %182, %181 : vector<16x128xf32>
    %184 = math.tanh %183 : vector<16x128xf32>
    %cst_86 = arith.constant 1.000000e+00 : f32
    %185 = vector.broadcast %cst_86 : f32 to vector<16x128xf32>
    %186 = arith.addf %185, %184 : vector<16x128xf32>
    %187 = arith.mulf %176, %186 : vector<16x128xf32>
    %c0_87 = arith.constant 0 : index
    %c0_88 = arith.constant 0 : index
    %c0_89 = arith.constant 0 : index
    %188 = vector.load %arg20[%c0_87, %c0_88, %c0_89] : memref<2x128x32xf32, #tpu.memory_space<vmem>>, vector<1x128x32xf32>
    %189 = vector.shape_cast %188 : vector<1x128x32xf32> to vector<128x32xf32>
    %cst_90 = arith.constant dense<0.000000e+00> : vector<16x32xf32>
    %190 = tpu.matmul %187, %189, %cst_90 {dimension_numbers = #tpu.dot_dimension_numbers<[1], [0], [0], [1], [0, 0, 1, 1], [], []>} : vector<16x128xf32>, vector<128x32xf32>, vector<16x32xf32> -> vector<16x32xf32>
    %191 = arith.addf %143, %190 : vector<16x32xf32>
    %c0_91 = arith.constant 0 : index
    %c0_92 = arith.constant 0 : index
    %c0_93 = arith.constant 0 : index
    %192 = vector.load %arg21[%c0_91, %c0_92, %c0_93] : memref<2x1x32xf32, #tpu.memory_space<vmem>>, vector<1x1x32xf32>
    %193 = vector.shape_cast %192 : vector<1x1x32xf32> to vector<1x32xf32>
    %194 = vector.broadcast %193 : vector<1x32xf32> to vector<16x32xf32>
    %195 = arith.addf %191, %194 : vector<16x32xf32>
    %c1 = arith.constant 1 : index
    %c0_94 = arith.constant 0 : index
    %c0_95 = arith.constant 0 : index
    %196 = vector.load %arg10[%c1, %c0_94, %c0_95] : memref<2x1x32xf32, #tpu.memory_space<vmem>>, vector<1x1x32xf32>
    %197 = vector.shape_cast %196 : vector<1x1x32xf32> to vector<1x32xf32>
    %c1_96 = arith.constant 1 : index
    %c0_97 = arith.constant 0 : index
    %c0_98 = arith.constant 0 : index
    %198 = vector.load %arg11[%c1_96, %c0_97, %c0_98] : memref<2x1x32xf32, #tpu.memory_space<vmem>>, vector<1x1x32xf32>
    %199 = vector.shape_cast %198 : vector<1x1x32xf32> to vector<1x32xf32>
    %cst_99 = arith.constant dense<0.000000e+00> : vector<16xf32>
    %200 = vector.multi_reduction <add>, %195, %cst_99 [1] : vector<16x32xf32> to vector<16xf32>
    %201 = vector.shape_cast %200 : vector<16xf32> to vector<16x1xf32>
    %cst_100 = arith.constant 3.200000e+01 : f32
    %202 = vector.broadcast %cst_100 : f32 to vector<16x1xf32>
    %203 = arith.divf %201, %202 : vector<16x1xf32>
    %204 = vector.broadcast %203 : vector<16x1xf32> to vector<16x32xf32>
    %205 = arith.subf %195, %204 : vector<16x32xf32>
    %206 = arith.mulf %205, %205 : vector<16x32xf32>
    %cst_101 = arith.constant dense<0.000000e+00> : vector<16xf32>
    %207 = vector.multi_reduction <add>, %206, %cst_101 [1] : vector<16x32xf32> to vector<16xf32>
    %208 = vector.shape_cast %207 : vector<16xf32> to vector<16x1xf32>
    %cst_102 = arith.constant 3.200000e+01 : f32
    %209 = vector.broadcast %cst_102 : f32 to vector<16x1xf32>
    %210 = arith.divf %208, %209 : vector<16x1xf32>
    %cst_103 = arith.constant 9.99999974E-6 : f32
    %211 = vector.broadcast %cst_103 : f32 to vector<16x1xf32>
    %212 = arith.addf %210, %211 : vector<16x1xf32>
    %213 = math.rsqrt %212 : vector<16x1xf32>
    %214 = vector.broadcast %213 : vector<16x1xf32> to vector<16x32xf32>
    %215 = arith.mulf %205, %214 : vector<16x32xf32>
    %216 = vector.broadcast %197 : vector<1x32xf32> to vector<16x32xf32>
    %217 = arith.mulf %215, %216 : vector<16x32xf32>
    %218 = vector.broadcast %199 : vector<1x32xf32> to vector<16x32xf32>
    %219 = arith.addf %217, %218 : vector<16x32xf32>
    %c1_104 = arith.constant 1 : index
    %c0_105 = arith.constant 0 : index
    %c0_106 = arith.constant 0 : index
    %220 = vector.load %arg12[%c1_104, %c0_105, %c0_106] : memref<2x32x96xf32, #tpu.memory_space<vmem>>, vector<1x32x96xf32>
    %221 = vector.shape_cast %220 : vector<1x32x96xf32> to vector<32x96xf32>
    %cst_107 = arith.constant dense<0.000000e+00> : vector<16x96xf32>
    %222 = tpu.matmul %219, %221, %cst_107 {dimension_numbers = #tpu.dot_dimension_numbers<[1], [0], [0], [1], [0, 0, 1, 1], [], []>} : vector<16x32xf32>, vector<32x96xf32>, vector<16x96xf32> -> vector<16x96xf32>
    %c1_108 = arith.constant 1 : index
    %c0_109 = arith.constant 0 : index
    %c0_110 = arith.constant 0 : index
    %223 = vector.load %arg13[%c1_108, %c0_109, %c0_110] : memref<2x1x96xf32, #tpu.memory_space<vmem>>, vector<1x1x96xf32>
    %224 = vector.shape_cast %223 : vector<1x1x96xf32> to vector<1x96xf32>
    %225 = vector.broadcast %224 : vector<1x96xf32> to vector<16x96xf32>
    %226 = arith.addf %222, %225 : vector<16x96xf32>
    %227 = vector.extract_strided_slice %226 {offsets = [0, 0], sizes = [8, 16], strides = [1, 1]} : vector<16x96xf32> to vector<8x16xf32>
    %228 = vector.extract_strided_slice %226 {offsets = [0, 32], sizes = [8, 16], strides = [1, 1]} : vector<16x96xf32> to vector<8x16xf32>
    %229 = vector.extract_strided_slice %226 {offsets = [0, 64], sizes = [8, 16], strides = [1, 1]} : vector<16x96xf32> to vector<8x16xf32>
    %cst_111 = arith.constant dense<0.000000e+00> : vector<8x8xf32>
    %230 = tpu.matmul %227, %228, %cst_111 {dimension_numbers = #tpu.dot_dimension_numbers<[1], [1], [0], [0], [0, 0, 1, 0], [], []>} : vector<8x16xf32>, vector<8x16xf32>, vector<8x8xf32> -> vector<8x8xf32>
    %cst_112 = arith.constant 2.500000e-01 : f32
    %231 = vector.broadcast %cst_112 : f32 to vector<8x8xf32>
    %232 = arith.mulf %230, %231 : vector<8x8xf32>
    %cst_113 = arith.constant dense<0xFF800000> : vector<8xf32>
    %233 = vector.multi_reduction <maximumf>, %232, %cst_113 [1] : vector<8x8xf32> to vector<8xf32>
    %234 = vector.shape_cast %233 : vector<8xf32> to vector<8x1xf32>
    %235 = vector.broadcast %234 : vector<8x1xf32> to vector<8x8xf32>
    %236 = arith.subf %232, %235 : vector<8x8xf32>
    %237 = math.exp %236 : vector<8x8xf32>
    %cst_114 = arith.constant dense<0.000000e+00> : vector<8xf32>
    %238 = vector.multi_reduction <add>, %237, %cst_114 [1] : vector<8x8xf32> to vector<8xf32>
    %239 = vector.shape_cast %238 : vector<8xf32> to vector<8x1xf32>
    %240 = tpu.reciprocal %239 {approx = true} : vector<8x1xf32> -> vector<8x1xf32>
    %241 = vector.broadcast %240 : vector<8x1xf32> to vector<8x8xf32>
    %242 = arith.mulf %237, %241 : vector<8x8xf32>
    %cst_115 = arith.constant dense<0.000000e+00> : vector<8x16xf32>
    %243 = tpu.matmul %242, %229, %cst_115 {dimension_numbers = #tpu.dot_dimension_numbers<[1], [0], [0], [1], [0, 0, 1, 1], [], []>} : vector<8x8xf32>, vector<8x16xf32>, vector<8x16xf32> -> vector<8x16xf32>
    %244 = vector.extract_strided_slice %226 {offsets = [0, 16], sizes = [8, 16], strides = [1, 1]} : vector<16x96xf32> to vector<8x16xf32>
    %245 = vector.extract_strided_slice %226 {offsets = [0, 48], sizes = [8, 16], strides = [1, 1]} : vector<16x96xf32> to vector<8x16xf32>
    %246 = vector.extract_strided_slice %226 {offsets = [0, 80], sizes = [8, 16], strides = [1, 1]} : vector<16x96xf32> to vector<8x16xf32>
    %cst_116 = arith.constant dense<0.000000e+00> : vector<8x8xf32>
    %247 = tpu.matmul %244, %245, %cst_116 {dimension_numbers = #tpu.dot_dimension_numbers<[1], [1], [0], [0], [0, 0, 1, 0], [], []>} : vector<8x16xf32>, vector<8x16xf32>, vector<8x8xf32> -> vector<8x8xf32>
    %cst_117 = arith.constant 2.500000e-01 : f32
    %248 = vector.broadcast %cst_117 : f32 to vector<8x8xf32>
    %249 = arith.mulf %247, %248 : vector<8x8xf32>
    %cst_118 = arith.constant dense<0xFF800000> : vector<8xf32>
    %250 = vector.multi_reduction <maximumf>, %249, %cst_118 [1] : vector<8x8xf32> to vector<8xf32>
    %251 = vector.shape_cast %250 : vector<8xf32> to vector<8x1xf32>
    %252 = vector.broadcast %251 : vector<8x1xf32> to vector<8x8xf32>
    %253 = arith.subf %249, %252 : vector<8x8xf32>
    %254 = math.exp %253 : vector<8x8xf32>
    %cst_119 = arith.constant dense<0.000000e+00> : vector<8xf32>
    %255 = vector.multi_reduction <add>, %254, %cst_119 [1] : vector<8x8xf32> to vector<8xf32>
    %256 = vector.shape_cast %255 : vector<8xf32> to vector<8x1xf32>
    %257 = tpu.reciprocal %256 {approx = true} : vector<8x1xf32> -> vector<8x1xf32>
    %258 = vector.broadcast %257 : vector<8x1xf32> to vector<8x8xf32>
    %259 = arith.mulf %254, %258 : vector<8x8xf32>
    %cst_120 = arith.constant dense<0.000000e+00> : vector<8x16xf32>
    %260 = tpu.matmul %259, %246, %cst_120 {dimension_numbers = #tpu.dot_dimension_numbers<[1], [0], [0], [1], [0, 0, 1, 1], [], []>} : vector<8x8xf32>, vector<8x16xf32>, vector<8x16xf32> -> vector<8x16xf32>
    %261 = tpu.concatenate %243, %260 in 1 : vector<8x16xf32>, vector<8x16xf32> -> vector<8x32xf32>
    %262 = vector.extract_strided_slice %226 {offsets = [8, 0], sizes = [8, 16], strides = [1, 1]} : vector<16x96xf32> to vector<8x16xf32>
    %263 = vector.extract_strided_slice %226 {offsets = [8, 32], sizes = [8, 16], strides = [1, 1]} : vector<16x96xf32> to vector<8x16xf32>
    %264 = vector.extract_strided_slice %226 {offsets = [8, 64], sizes = [8, 16], strides = [1, 1]} : vector<16x96xf32> to vector<8x16xf32>
    %cst_121 = arith.constant dense<0.000000e+00> : vector<8x8xf32>
    %265 = tpu.matmul %262, %263, %cst_121 {dimension_numbers = #tpu.dot_dimension_numbers<[1], [1], [0], [0], [0, 0, 1, 0], [], []>} : vector<8x16xf32>, vector<8x16xf32>, vector<8x8xf32> -> vector<8x8xf32>
    %cst_122 = arith.constant 2.500000e-01 : f32
    %266 = vector.broadcast %cst_122 : f32 to vector<8x8xf32>
    %267 = arith.mulf %265, %266 : vector<8x8xf32>
    %cst_123 = arith.constant dense<0xFF800000> : vector<8xf32>
    %268 = vector.multi_reduction <maximumf>, %267, %cst_123 [1] : vector<8x8xf32> to vector<8xf32>
    %269 = vector.shape_cast %268 : vector<8xf32> to vector<8x1xf32>
    %270 = vector.broadcast %269 : vector<8x1xf32> to vector<8x8xf32>
    %271 = arith.subf %267, %270 : vector<8x8xf32>
    %272 = math.exp %271 : vector<8x8xf32>
    %cst_124 = arith.constant dense<0.000000e+00> : vector<8xf32>
    %273 = vector.multi_reduction <add>, %272, %cst_124 [1] : vector<8x8xf32> to vector<8xf32>
    %274 = vector.shape_cast %273 : vector<8xf32> to vector<8x1xf32>
    %275 = tpu.reciprocal %274 {approx = true} : vector<8x1xf32> -> vector<8x1xf32>
    %276 = vector.broadcast %275 : vector<8x1xf32> to vector<8x8xf32>
    %277 = arith.mulf %272, %276 : vector<8x8xf32>
    %cst_125 = arith.constant dense<0.000000e+00> : vector<8x16xf32>
    %278 = tpu.matmul %277, %264, %cst_125 {dimension_numbers = #tpu.dot_dimension_numbers<[1], [0], [0], [1], [0, 0, 1, 1], [], []>} : vector<8x8xf32>, vector<8x16xf32>, vector<8x16xf32> -> vector<8x16xf32>
    %279 = vector.extract_strided_slice %226 {offsets = [8, 16], sizes = [8, 16], strides = [1, 1]} : vector<16x96xf32> to vector<8x16xf32>
    %280 = vector.extract_strided_slice %226 {offsets = [8, 48], sizes = [8, 16], strides = [1, 1]} : vector<16x96xf32> to vector<8x16xf32>
    %281 = vector.extract_strided_slice %226 {offsets = [8, 80], sizes = [8, 16], strides = [1, 1]} : vector<16x96xf32> to vector<8x16xf32>
    %cst_126 = arith.constant dense<0.000000e+00> : vector<8x8xf32>
    %282 = tpu.matmul %279, %280, %cst_126 {dimension_numbers = #tpu.dot_dimension_numbers<[1], [1], [0], [0], [0, 0, 1, 0], [], []>} : vector<8x16xf32>, vector<8x16xf32>, vector<8x8xf32> -> vector<8x8xf32>
    %cst_127 = arith.constant 2.500000e-01 : f32
    %283 = vector.broadcast %cst_127 : f32 to vector<8x8xf32>
    %284 = arith.mulf %282, %283 : vector<8x8xf32>
    %cst_128 = arith.constant dense<0xFF800000> : vector<8xf32>
    %285 = vector.multi_reduction <maximumf>, %284, %cst_128 [1] : vector<8x8xf32> to vector<8xf32>
    %286 = vector.shape_cast %285 : vector<8xf32> to vector<8x1xf32>
    %287 = vector.broadcast %286 : vector<8x1xf32> to vector<8x8xf32>
    %288 = arith.subf %284, %287 : vector<8x8xf32>
    %289 = math.exp %288 : vector<8x8xf32>
    %cst_129 = arith.constant dense<0.000000e+00> : vector<8xf32>
    %290 = vector.multi_reduction <add>, %289, %cst_129 [1] : vector<8x8xf32> to vector<8xf32>
    %291 = vector.shape_cast %290 : vector<8xf32> to vector<8x1xf32>
    %292 = tpu.reciprocal %291 {approx = true} : vector<8x1xf32> -> vector<8x1xf32>
    %293 = vector.broadcast %292 : vector<8x1xf32> to vector<8x8xf32>
    %294 = arith.mulf %289, %293 : vector<8x8xf32>
    %cst_130 = arith.constant dense<0.000000e+00> : vector<8x16xf32>
    %295 = tpu.matmul %294, %281, %cst_130 {dimension_numbers = #tpu.dot_dimension_numbers<[1], [0], [0], [1], [0, 0, 1, 1], [], []>} : vector<8x8xf32>, vector<8x16xf32>, vector<8x16xf32> -> vector<8x16xf32>
    %296 = tpu.concatenate %278, %295 in 1 : vector<8x16xf32>, vector<8x16xf32> -> vector<8x32xf32>
    %297 = tpu.concatenate %261, %296 in 0 : vector<8x32xf32>, vector<8x32xf32> -> vector<16x32xf32>
    %c1_131 = arith.constant 1 : index
    %c0_132 = arith.constant 0 : index
    %c0_133 = arith.constant 0 : index
    %298 = vector.load %arg14[%c1_131, %c0_132, %c0_133] : memref<2x32x32xf32, #tpu.memory_space<vmem>>, vector<1x32x32xf32>
    %299 = vector.shape_cast %298 : vector<1x32x32xf32> to vector<32x32xf32>
    %cst_134 = arith.constant dense<0.000000e+00> : vector<16x32xf32>
    %300 = tpu.matmul %297, %299, %cst_134 {dimension_numbers = #tpu.dot_dimension_numbers<[1], [0], [0], [1], [0, 0, 1, 1], [], []>} : vector<16x32xf32>, vector<32x32xf32>, vector<16x32xf32> -> vector<16x32xf32>
    %301 = arith.addf %195, %300 : vector<16x32xf32>
    %c1_135 = arith.constant 1 : index
    %c0_136 = arith.constant 0 : index
    %c0_137 = arith.constant 0 : index
    %302 = vector.load %arg15[%c1_135, %c0_136, %c0_137] : memref<2x1x32xf32, #tpu.memory_space<vmem>>, vector<1x1x32xf32>
    %303 = vector.shape_cast %302 : vector<1x1x32xf32> to vector<1x32xf32>
    %304 = vector.broadcast %303 : vector<1x32xf32> to vector<16x32xf32>
    %305 = arith.addf %301, %304 : vector<16x32xf32>
    %c1_138 = arith.constant 1 : index
    %c0_139 = arith.constant 0 : index
    %c0_140 = arith.constant 0 : index
    %306 = vector.load %arg16[%c1_138, %c0_139, %c0_140] : memref<2x1x32xf32, #tpu.memory_space<vmem>>, vector<1x1x32xf32>
    %307 = vector.shape_cast %306 : vector<1x1x32xf32> to vector<1x32xf32>
    %c1_141 = arith.constant 1 : index
    %c0_142 = arith.constant 0 : index
    %c0_143 = arith.constant 0 : index
    %308 = vector.load %arg17[%c1_141, %c0_142, %c0_143] : memref<2x1x32xf32, #tpu.memory_space<vmem>>, vector<1x1x32xf32>
    %309 = vector.shape_cast %308 : vector<1x1x32xf32> to vector<1x32xf32>
    %cst_144 = arith.constant dense<0.000000e+00> : vector<16xf32>
    %310 = vector.multi_reduction <add>, %305, %cst_144 [1] : vector<16x32xf32> to vector<16xf32>
    %311 = vector.shape_cast %310 : vector<16xf32> to vector<16x1xf32>
    %cst_145 = arith.constant 3.200000e+01 : f32
    %312 = vector.broadcast %cst_145 : f32 to vector<16x1xf32>
    %313 = arith.divf %311, %312 : vector<16x1xf32>
    %314 = vector.broadcast %313 : vector<16x1xf32> to vector<16x32xf32>
    %315 = arith.subf %305, %314 : vector<16x32xf32>
    %316 = arith.mulf %315, %315 : vector<16x32xf32>
    %cst_146 = arith.constant dense<0.000000e+00> : vector<16xf32>
    %317 = vector.multi_reduction <add>, %316, %cst_146 [1] : vector<16x32xf32> to vector<16xf32>
    %318 = vector.shape_cast %317 : vector<16xf32> to vector<16x1xf32>
    %cst_147 = arith.constant 3.200000e+01 : f32
    %319 = vector.broadcast %cst_147 : f32 to vector<16x1xf32>
    %320 = arith.divf %318, %319 : vector<16x1xf32>
    %cst_148 = arith.constant 9.99999974E-6 : f32
    %321 = vector.broadcast %cst_148 : f32 to vector<16x1xf32>
    %322 = arith.addf %320, %321 : vector<16x1xf32>
    %323 = math.rsqrt %322 : vector<16x1xf32>
    %324 = vector.broadcast %323 : vector<16x1xf32> to vector<16x32xf32>
    %325 = arith.mulf %315, %324 : vector<16x32xf32>
    %326 = vector.broadcast %307 : vector<1x32xf32> to vector<16x32xf32>
    %327 = arith.mulf %325, %326 : vector<16x32xf32>
    %328 = vector.broadcast %309 : vector<1x32xf32> to vector<16x32xf32>
    %329 = arith.addf %327, %328 : vector<16x32xf32>
    %c1_149 = arith.constant 1 : index
    %c0_150 = arith.constant 0 : index
    %c0_151 = arith.constant 0 : index
    %330 = vector.load %arg18[%c1_149, %c0_150, %c0_151] : memref<2x32x128xf32, #tpu.memory_space<vmem>>, vector<1x32x128xf32>
    %331 = vector.shape_cast %330 : vector<1x32x128xf32> to vector<32x128xf32>
    %cst_152 = arith.constant dense<0.000000e+00> : vector<16x128xf32>
    %332 = tpu.matmul %329, %331, %cst_152 {dimension_numbers = #tpu.dot_dimension_numbers<[1], [0], [0], [1], [0, 0, 1, 1], [], []>} : vector<16x32xf32>, vector<32x128xf32>, vector<16x128xf32> -> vector<16x128xf32>
    %c1_153 = arith.constant 1 : index
    %c0_154 = arith.constant 0 : index
    %c0_155 = arith.constant 0 : index
    %333 = vector.load %arg19[%c1_153, %c0_154, %c0_155] : memref<2x1x128xf32, #tpu.memory_space<vmem>>, vector<1x1x128xf32>
    %334 = vector.shape_cast %333 : vector<1x1x128xf32> to vector<1x128xf32>
    %335 = vector.broadcast %334 : vector<1x128xf32> to vector<16x128xf32>
    %336 = arith.addf %332, %335 : vector<16x128xf32>
    %cst_156 = arith.constant 5.000000e-01 : f32
    %337 = vector.broadcast %cst_156 : f32 to vector<16x128xf32>
    %338 = arith.mulf %337, %336 : vector<16x128xf32>
    %cst_157 = arith.constant 4.471500e-02 : f32
    %339 = vector.broadcast %cst_157 : f32 to vector<16x128xf32>
    %340 = arith.mulf %339, %336 : vector<16x128xf32>
    %341 = arith.mulf %340, %336 : vector<16x128xf32>
    %342 = arith.mulf %341, %336 : vector<16x128xf32>
    %343 = arith.addf %336, %342 : vector<16x128xf32>
    %cst_158 = arith.constant 0.797884583 : f32
    %344 = vector.broadcast %cst_158 : f32 to vector<16x128xf32>
    %345 = arith.mulf %344, %343 : vector<16x128xf32>
    %346 = math.tanh %345 : vector<16x128xf32>
    %cst_159 = arith.constant 1.000000e+00 : f32
    %347 = vector.broadcast %cst_159 : f32 to vector<16x128xf32>
    %348 = arith.addf %347, %346 : vector<16x128xf32>
    %349 = arith.mulf %338, %348 : vector<16x128xf32>
    %c1_160 = arith.constant 1 : index
    %c0_161 = arith.constant 0 : index
    %c0_162 = arith.constant 0 : index
    %350 = vector.load %arg20[%c1_160, %c0_161, %c0_162] : memref<2x128x32xf32, #tpu.memory_space<vmem>>, vector<1x128x32xf32>
    %351 = vector.shape_cast %350 : vector<1x128x32xf32> to vector<128x32xf32>
    %cst_163 = arith.constant dense<0.000000e+00> : vector<16x32xf32>
    %352 = tpu.matmul %349, %351, %cst_163 {dimension_numbers = #tpu.dot_dimension_numbers<[1], [0], [0], [1], [0, 0, 1, 1], [], []>} : vector<16x128xf32>, vector<128x32xf32>, vector<16x32xf32> -> vector<16x32xf32>
    %353 = arith.addf %305, %352 : vector<16x32xf32>
    %c1_164 = arith.constant 1 : index
    %c0_165 = arith.constant 0 : index
    %c0_166 = arith.constant 0 : index
    %354 = vector.load %arg21[%c1_164, %c0_165, %c0_166] : memref<2x1x32xf32, #tpu.memory_space<vmem>>, vector<1x1x32xf32>
    %355 = vector.shape_cast %354 : vector<1x1x32xf32> to vector<1x32xf32>
    %356 = vector.broadcast %355 : vector<1x32xf32> to vector<16x32xf32>
    %357 = arith.addf %353, %356 : vector<16x32xf32>
    %c0_167 = arith.constant 0 : index
    %c0_168 = arith.constant 0 : index
    %358 = vector.load %arg22[%c0_167, %c0_168] : memref<1x32xf32, #tpu.memory_space<vmem>>, vector<1x32xf32>
    %c0_169 = arith.constant 0 : index
    %c0_170 = arith.constant 0 : index
    %359 = vector.load %arg23[%c0_169, %c0_170] : memref<1x32xf32, #tpu.memory_space<vmem>>, vector<1x32xf32>
    %cst_171 = arith.constant dense<0.000000e+00> : vector<16xf32>
    %360 = vector.multi_reduction <add>, %357, %cst_171 [1] : vector<16x32xf32> to vector<16xf32>
    %361 = vector.shape_cast %360 : vector<16xf32> to vector<16x1xf32>
    %cst_172 = arith.constant 3.200000e+01 : f32
    %362 = vector.broadcast %cst_172 : f32 to vector<16x1xf32>
    %363 = arith.divf %361, %362 : vector<16x1xf32>
    %364 = vector.broadcast %363 : vector<16x1xf32> to vector<16x32xf32>
    %365 = arith.subf %357, %364 : vector<16x32xf32>
    %366 = arith.mulf %365, %365 : vector<16x32xf32>
    %cst_173 = arith.constant dense<0.000000e+00> : vector<16xf32>
    %367 = vector.multi_reduction <add>, %366, %cst_173 [1] : vector<16x32xf32> to vector<16xf32>
    %368 = vector.shape_cast %367 : vector<16xf32> to vector<16x1xf32>
    %cst_174 = arith.constant 3.200000e+01 : f32
    %369 = vector.broadcast %cst_174 : f32 to vector<16x1xf32>
    %370 = arith.divf %368, %369 : vector<16x1xf32>
    %cst_175 = arith.constant 9.99999974E-6 : f32
    %371 = vector.broadcast %cst_175 : f32 to vector<16x1xf32>
    %372 = arith.addf %370, %371 : vector<16x1xf32>
    %373 = math.rsqrt %372 : vector<16x1xf32>
    %374 = vector.broadcast %373 : vector<16x1xf32> to vector<16x32xf32>
    %375 = arith.mulf %365, %374 : vector<16x32xf32>
    %376 = vector.broadcast %358 : vector<1x32xf32> to vector<16x32xf32>
    %377 = arith.mulf %375, %376 : vector<16x32xf32>
    %378 = vector.broadcast %359 : vector<1x32xf32> to vector<16x32xf32>
    %379 = arith.addf %377, %378 : vector<16x32xf32>
    %c0_176 = arith.constant 0 : index
    %c0_177 = arith.constant 0 : index
    %380 = vector.load %arg24[%c0_176, %c0_177] : memref<32x12xf32, #tpu.memory_space<vmem>>, vector<32x12xf32>
    %cst_178 = arith.constant dense<0.000000e+00> : vector<16x12xf32>
    %381 = tpu.matmul %379, %380, %cst_178 {dimension_numbers = #tpu.dot_dimension_numbers<[1], [0], [0], [1], [0, 0, 1, 1], [], []>} : vector<16x32xf32>, vector<32x12xf32>, vector<16x12xf32> -> vector<16x12xf32>
    %c0_179 = arith.constant 0 : index
    %c0_180 = arith.constant 0 : index
    %382 = vector.load %arg25[%c0_179, %c0_180] : memref<1x12xf32, #tpu.memory_space<vmem>>, vector<1x12xf32>
    %383 = vector.broadcast %382 : vector<1x12xf32> to vector<16x12xf32>
    %384 = arith.addf %381, %383 : vector<16x12xf32>
    %c0_181 = arith.constant 0 : index
    %c0_182 = arith.constant 0 : index
    %385 = vector.load %arg26[%c0_181, %c0_182] : memref<16x12xf32, #tpu.memory_space<vmem>>, vector<16x12xf32>
    tpu.vector_store %arg26[%c0_181, %c0_182], %384 {strides = array<i32>} : memref<16x12xf32, #tpu.memory_space<vmem>>, vector<16x12xf32>,
    return
  }
  func.func @transform_0(%arg0: i32) -> (i32, i32) {
    %c0_i32 = arith.constant 0 : i32
    %c0_i32_0 = arith.constant 0 : i32
    %c0_i32_1 = arith.constant 0 : i32
    return %c0_i32, %c0_i32_0 : i32, i32
  }
  func.func @transform_1(%arg0: i32) -> (i32, i32) {
    %c0_i32 = arith.constant 0 : i32
    %c0_i32_0 = arith.constant 0 : i32
    %c0_i32_1 = arith.constant 0 : i32
    return %c0_i32, %c0_i32_0 : i32, i32
  }
  func.func @transform_2(%arg0: i32) -> (i32, i32) {
    %c0_i32 = arith.constant 0 : i32
    %c0_i32_0 = arith.constant 0 : i32
    %c0_i32_1 = arith.constant 0 : i32
    return %c0_i32, %c0_i32_0 : i32, i32
  }
  func.func @transform_3(%arg0: i32) -> (i32, i32) {
    %c0_i32 = arith.constant 0 : i32
    %c0_i32_0 = arith.constant 0 : i32
    %c0_i32_1 = arith.constant 0 : i32
    return %c0_i32, %c0_i32_0 : i32, i32
  }
  func.func @transform_4(%arg0: i32) -> (i32, i32) {
    %c0_i32 = arith.constant 0 : i32
    %c0_i32_0 = arith.constant 0 : i32
    %c0_i32_1 = arith.constant 0 : i32
    return %c0_i32, %c0_i32_0 : i32, i32
  }
  func.func @transform_5(%arg0: i32) -> (i32, i32) {
    %c0_i32 = arith.constant 0 : i32
    %c0_i32_0 = arith.constant 0 : i32
    %c0_i32_1 = arith.constant 0 : i32
    return %c0_i32, %c0_i32_0 : i32, i32
  }
  func.func @transform_6(%arg0: i32) -> (i32, i32) {
    %c0_i32 = arith.constant 0 : i32
    %c0_i32_0 = arith.constant 0 : i32
    %c0_i32_1 = arith.constant 0 : i32
    return %c0_i32, %c0_i32_0 : i32, i32
  }
  func.func @transform_7(%arg0: i32) -> (i32, i32) {
    %c0_i32 = arith.constant 0 : i32
    %c0_i32_0 = arith.constant 0 : i32
    %c0_i32_1 = arith.constant 0 : i32
    return %c0_i32, %c0_i32_0 : i32, i32
  }
  func.func @transform_8(%arg0: i32) -> (i32, i32) {
    %c0_i32 = arith.constant 0 : i32
    %c0_i32_0 = arith.constant 0 : i32
    %c0_i32_1 = arith.constant 0 : i32
    return %c0_i32, %c0_i32_0 : i32, i32
  }
  func.func @transform_9(%arg0: i32) -> (i32, i32, i32) {
    %c0_i32 = arith.constant 0 : i32
    %c0_i32_0 = arith.constant 0 : i32
    %c0_i32_1 = arith.constant 0 : i32
    %c0_i32_2 = arith.constant 0 : i32
    return %c0_i32, %c0_i32_0, %c0_i32_1 : i32, i32, i32
  }
  func.func @transform_10(%arg0: i32) -> (i32, i32, i32) {
    %c0_i32 = arith.constant 0 : i32
    %c0_i32_0 = arith.constant 0 : i32
    %c0_i32_1 = arith.constant 0 : i32
    %c0_i32_2 = arith.constant 0 : i32
    return %c0_i32, %c0_i32_0, %c0_i32_1 : i32, i32, i32
  }
  func.func @transform_11(%arg0: i32) -> (i32, i32, i32) {
    %c0_i32 = arith.constant 0 : i32
    %c0_i32_0 = arith.constant 0 : i32
    %c0_i32_1 = arith.constant 0 : i32
    %c0_i32_2 = arith.constant 0 : i32
    return %c0_i32, %c0_i32_0, %c0_i32_1 : i32, i32, i32
  }
  func.func @transform_12(%arg0: i32) -> (i32, i32, i32) {
    %c0_i32 = arith.constant 0 : i32
    %c0_i32_0 = arith.constant 0 : i32
    %c0_i32_1 = arith.constant 0 : i32
    %c0_i32_2 = arith.constant 0 : i32
    return %c0_i32, %c0_i32_0, %c0_i32_1 : i32, i32, i32
  }
  func.func @transform_13(%arg0: i32) -> (i32, i32, i32) {
    %c0_i32 = arith.constant 0 : i32
    %c0_i32_0 = arith.constant 0 : i32
    %c0_i32_1 = arith.constant 0 : i32
    %c0_i32_2 = arith.constant 0 : i32
    return %c0_i32, %c0_i32_0, %c0_i32_1 : i32, i32, i32
  }
  func.func @transform_14(%arg0: i32) -> (i32, i32, i32) {
    %c0_i32 = arith.constant 0 : i32
    %c0_i32_0 = arith.constant 0 : i32
    %c0_i32_1 = arith.constant 0 : i32
    %c0_i32_2 = arith.constant 0 : i32
    return %c0_i32, %c0_i32_0, %c0_i32_1 : i32, i32, i32
  }
  func.func @transform_15(%arg0: i32) -> (i32, i32, i32) {
    %c0_i32 = arith.constant 0 : i32
    %c0_i32_0 = arith.constant 0 : i32
    %c0_i32_1 = arith.constant 0 : i32
    %c0_i32_2 = arith.constant 0 : i32
    return %c0_i32, %c0_i32_0, %c0_i32_1 : i32, i32, i32
  }
  func.func @transform_16(%arg0: i32) -> (i32, i32, i32) {
    %c0_i32 = arith.constant 0 : i32
    %c0_i32_0 = arith.constant 0 : i32
    %c0_i32_1 = arith.constant 0 : i32
    %c0_i32_2 = arith.constant 0 : i32
    return %c0_i32, %c0_i32_0, %c0_i32_1 : i32, i32, i32
  }
  func.func @transform_17(%arg0: i32) -> (i32, i32, i32) {
    %c0_i32 = arith.constant 0 : i32
    %c0_i32_0 = arith.constant 0 : i32
    %c0_i32_1 = arith.constant 0 : i32
    %c0_i32_2 = arith.constant 0 : i32
    return %c0_i32, %c0_i32_0, %c0_i32_1 : i32, i32, i32
  }
  func.func @transform_18(%arg0: i32) -> (i32, i32, i32) {
    %c0_i32 = arith.constant 0 : i32
    %c0_i32_0 = arith.constant 0 : i32
    %c0_i32_1 = arith.constant 0 : i32
    %c0_i32_2 = arith.constant 0 : i32
    return %c0_i32, %c0_i32_0, %c0_i32_1 : i32, i32, i32
  }
  func.func @transform_19(%arg0: i32) -> (i32, i32, i32) {
    %c0_i32 = arith.constant 0 : i32
    %c0_i32_0 = arith.constant 0 : i32
    %c0_i32_1 = arith.constant 0 : i32
    %c0_i32_2 = arith.constant 0 : i32
    return %c0_i32, %c0_i32_0, %c0_i32_1 : i32, i32, i32
  }
  func.func @transform_20(%arg0: i32) -> (i32, i32, i32) {
    %c0_i32 = arith.constant 0 : i32
    %c0_i32_0 = arith.constant 0 : i32
    %c0_i32_1 = arith.constant 0 : i32
    %c0_i32_2 = arith.constant 0 : i32
    return %c0_i32, %c0_i32_0, %c0_i32_1 : i32, i32, i32
  }
  func.func @transform_21(%arg0: i32) -> (i32, i32) {
    %c0_i32 = arith.constant 0 : i32
    %c0_i32_0 = arith.constant 0 : i32
    %c0_i32_1 = arith.constant 0 : i32
    return %c0_i32, %c0_i32_0 : i32, i32
  }
  func.func @transform_22(%arg0: i32) -> (i32, i32) {
    %c0_i32 = arith.constant 0 : i32
    %c0_i32_0 = arith.constant 0 : i32
    %c0_i32_1 = arith.constant 0 : i32
    return %c0_i32, %c0_i32_0 : i32, i32
  }
  func.func @transform_23(%arg0: i32) -> (i32, i32) {
    %c0_i32 = arith.constant 0 : i32
    %c0_i32_0 = arith.constant 0 : i32
    %c0_i32_1 = arith.constant 0 : i32
    return %c0_i32, %c0_i32_0 : i32, i32
  }
  func.func @transform_24(%arg0: i32) -> (i32, i32) {
    %c0_i32 = arith.constant 0 : i32
    %c0_i32_0 = arith.constant 0 : i32
    %c0_i32_1 = arith.constant 0 : i32
    return %c0_i32, %c0_i32_0 : i32, i32
  }
  func.func @transform_25(%arg0: i32) -> (i32, i32) {
    %c0_i32 = arith.constant 0 : i32
    %c0_i32_0 = arith.constant 0 : i32
    %c0_i32_1 = arith.constant 0 : i32
    return %c0_i32, %c0_i32_0 : i32, i32
  }
}

</mosaic_0001>

<bundles_post_ra>
// kernel: diffuser_policy_forward.1
= control target key start
LH: loop header
LB: loop body
LE: loop exit
PB: predicated region body
PF: predicated region fallthrough
CT: control target
= control target key end

     0   :  { %s4334_s0 = inlined_call_operand.vmem [shape: f32[16,12], index: 0, kind: input, shape index: {}]   ;;  %s4335_s1 = inlined_call_operand.vmem [shape: f32[2,32], index: 1, kind: input, shape index: {}]   ;;  %s4336_s2 = inlined_call_operand.vmem [shape: f32[12,32], index: 2, kind: input, shape index: {}]   ;;  %s4337_s3 = inlined_call_operand.vmem [shape: f32[1,32], index: 3, kind: input, shape index: {}]   ;;  %s4338_s4 = inlined_call_operand.vmem [shape: f32[32,128], index: 4, kind: input, shape index: {}]   ;;  %s4339_s5 = inlined_call_operand.vmem [shape: f32[1,128], index: 5, kind: input, shape index: {}]   ;;  %s4340_s6 = inlined_call_operand.vmem [shape: f32[128,32], index: 6, kind: input, shape index: {}]   ;;  %s4341_s7 = inlined_call_operand.vmem [shape: f32[1,32], index: 7, kind: input, shape index: {}]   ;;  %s4342_s8 = inlined_call_operand.vmem [shape: f32[8,32], index: 8, kind: input, shape index: {}]   ;;  %s4343_s9 = inlined_call_operand.vmem [shape: f32[2,1,32], index: 9, kind: input, shape index: {}]   ;;  %s4344_s10 = inlined_call_operand.vmem [shape: f32[2,1,32], index: 10, kind: input, shape index: {}]   ;;  %s4345_s11 = inlined_call_operand.vmem [shape: f32[2,32,96], index: 11, kind: input, shape index: {}]   ;;  %s4346_s12 = inlined_call_operand.vmem [shape: f32[2,1,96], index: 12, kind: input, shape index: {}]   ;;  %s4347_s13 = inlined_call_operand.vmem [shape: f32[2,32,32], index: 13, kind: input, shape index: {}]   ;;  %s4348_s14 = inlined_call_operand.vmem [shape: f32[2,1,32], index: 14, kind: input, shape index: {}]   ;;  %s4349_s15 = inlined_call_operand.vmem [shape: f32[2,1,32], index: 15, kind: input, shape index: {}]   ;;  %s4350_s16 = inlined_call_operand.vmem [shape: f32[2,1,32], index: 16, kind: input, shape index: {}]   ;;  %s4351_s17 = inlined_call_operand.vmem [shape: f32[2,32,128], index: 17, kind: input, shape index: {}]   ;;  %s4352_s18 = inlined_call_operand.vmem [shape: f32[2,1,128], index: 18, kind: input, shape index: {}]   ;;  %s4353_s19 = inlined_call_operand.vmem [shape: f32[2,128,32], index: 19, kind: input, shape index: {}]   ;;  %s4354_s20 = inlined_call_operand.vmem [shape: f32[2,1,32], index: 20, kind: input, shape index: {}]   ;;  %s4355_s21 = inlined_call_operand.vmem [shape: f32[1,32], index: 21, kind: input, shape index: {}]   ;;  %s4356_s22 = inlined_call_operand.vmem [shape: f32[1,32], index: 22, kind: input, shape index: {}]   ;;  %s4357_s23 = inlined_call_operand.vmem [shape: f32[32,12], index: 23, kind: input, shape index: {}]   ;;  %s4358_s24 = inlined_call_operand.vmem [shape: f32[1,12], index: 24, kind: input, shape index: {}]   ;;  %s4359_s25 = inlined_call_operand.hbm [shape: f32[16,12], index: 25, kind: output, shape index: {}]  }
   0x1   :  { %4369 = sst [smem:[#allocation5_spill]] %s4334_s0 }
   0x2   :  { %4370 = sst [smem:[#allocation6_spill]] %s4335_s1 }
   0x3   :  { %4371 = sst [smem:[#allocation7_spill]] %s4336_s2 }
   0x4   :  { %4372 = sst [smem:[#allocation8_spill]] %s4337_s3 }
   0x5   :  { %4373 = sst [smem:[#allocation9_spill]] %s4338_s4 }
   0x6   :  { %4374 = sst [smem:[#allocation10_spill]] %s4339_s5 }
   0x7   :  { %4375 = sst [smem:[#allocation11_spill]] %s4340_s6 }
   0x8   :  { %4376 = sst [smem:[#allocation12_spill]] %s4341_s7 }
   0x9   :  { %4377 = sst [smem:[#allocation13_spill]] %s4342_s8 }
   0xa   :  { %4378 = sst [smem:[#allocation14_spill]] %s4343_s9 }
   0xb   :  { %s4379_s6 = sld [smem:[#allocation7_spill]]  ;;  %vm99_vm0 = vcmask 1043456   ;;  %s4380_s1 = sld [smem:[#allocation5_spill]]  ;;  %vm3640_vm1 = vmmov 1   ;;  %vm92_vm3 = vcmask 97280  }
   0xc   :  { %vm3384_vm2 = vmpackc.low %vm99_vm0, %vm3640_vm1  ;;  %s4381_s4 = sld [smem:[#allocation9_spill]] }
  0x11   :  { %v83_v0 = vld [vmem:[%s4379_s6] sm:$0xff]  ;;  %v84_v1 = vld [vmem:[%s4379_s6 + $0x8] sm:$0xf] }
  0x12   :  { %v81_v2 = vld [vmem:[%s4380_s1] sm:$0xff]  ;;  %v3383_v3 = vpack.c.bf16 %v84_v1, %v83_v0  ;;  %v180_v5 = vld [vmem:[%s4381_s4 + $0x8] sm:$0xff] }
  0x13   :  { %v179_v4 = vld [vmem:[%s4381_s4] sm:$0xff]  ;;  %3107 = vmatprep.mubr.msk.f32.mxu0 %vm92_vm3, %v81_v2 }
  0x14   :  { %3385 = vmatprep.subr.msk.bf16.mxu0 %vm3384_vm2, %v3383_v3 }
  0x15   :  { %30 = vsyncpa [#allocation3], 0  ;;  %3388 = vmatpush3.bf16.msk.msra.mxu0 %vm3384_vm2, %v3383_v3  ;;  %v82_v6 = vld [vmem:[%s4380_s1 + $0x8] sm:$0xff]  ;;  %v3390_v7 = vpack.c.bf16 %v180_v5, %v179_v4  ;;  %v3641_v8 = vmov 0.0|0.0   ;;  %v181_v9 = vld [vmem:[%s4381_s4 + $0x10] sm:$0xff]  ;;  %vm3642_vm4 = vmmov 0   ;;  %v365_v49 = vlaneseq }
  0x16   :  { %3389 = vmatprep.subr.bf16.mxu0 %v3641_v8  ;;  %v182_v10 = vld [vmem:[%s4381_s4 + $0x18] sm:$0xff]  ;;  %v3643_v12 = vmov 0.0   ;;  %s4382_s26 = sld [smem:[#allocation6_spill]]  ;;  %vm190_vm5 = vcmask 261120   ;;  %s4383_s27 = sld [smem:[#allocation11_spill]]  ;;  %vm517_vm6 = vcmask 130048  }
  0x17   :  { %v3393_v11 = vpack.c.bf16 %v182_v10, %v181_v9  ;;  %s4384_s0 = sld [smem:[#allocation10_spill]]  ;;  %v366_v50 = vshrl.u32 %v365_v49, 7  ;;  %s4385_s2 = sld [smem:[#allocation8_spill]]  ;;  %vm593_vm7 = vcmask 64512  }
  0x18   :  { %3108 = vmatmul.mubr.msk.f32.vlgmr.msra.gmra.mrb[0].mxu0 %vm92_vm3, %v82_v6  ;;  %s4386_s7 = sld [smem:[#allocation12_spill]]  ;;  %s4387_s1 = sld [smem:[#allocation13_spill]] }
  0x19   :  { %3391 = vmatpush3.bf16.msra.mxu0 %v3390_v7  ;;  %3118 = vmatprep.mubr.msk.f32.mxu0 %vm3642_vm4, %v3643_v12  ;;  %v367_v55 = vsub.s32 0, %v366_v50  ;;  %v371_v56 = vsub.s32 1, %v366_v50  ;;  %s4388_s30 = sld [smem:[#allocation14_spill]]  ;;  %s3644_s8 = smov 96  }
  0x1a   :  { %3392 = vmatprep.subr.bf16.mxu0 %v3641_v8  ;;  %s3645_s4 = smov 80   ;;  %s3646_s28 = smov 64  }
  0x1b   :  { %s3647_s9 = smov 112   ;;  %s4367_s5 = smov 48  }
  0x1c   :  { %v178_v13 = vld [vmem:[%s4382_s26] sm:$0x3]  ;;  %v272_v15 = vld [vmem:[%s4383_s27 + $0x8] sm:$0xff]  ;;  %v273_v17 = vld [vmem:[%s4383_s27 + $0x10] sm:$0xff] }
  0x1d   :  { %3394 = vmatpush3.bf16.msra.mxu0 %v3393_v11  ;;  %v271_v14 = vld [vmem:[%s4383_s27] sm:$0xff]  ;;  %v274_v18 = vld [vmem:[%s4383_s27 + $0x18] sm:$0xff]  ;;  %v276_v21 = vld [vmem:[%s4383_s27 + $0x28] sm:$0xff] }
  0x1e   :  { %3395 = vmatprep.subr.bf16.mxu0 %v3641_v8  ;;  %v3396_v16 = vpack.c.bf16 %v272_v15, %v271_v14  ;;  %v3399_v19 = vpack.c.bf16 %v274_v18, %v273_v17  ;;  %v275_v20 = vld [vmem:[%s4383_s27 + $0x20] sm:$0xff]  ;;  %v277_v23 = vld [vmem:[%s4383_s27 + $0x30] sm:$0xff]  ;;  %v278_v24 = vld [vmem:[%s4383_s27 + $0x38] sm:$0xff] }
  0x1f   :  { %v3402_v22 = vpack.c.bf16 %v276_v21, %v275_v20  ;;  %v3405_v25 = vpack.c.bf16 %v278_v24, %v277_v23  ;;  %v279_v26 = vld [vmem:[%s4383_s27 + $0x40] sm:$0xff]  ;;  %v280_v27 = vld [vmem:[%s4383_s27 + $0x48] sm:$0xff]  ;;  %v281_v29 = vld [vmem:[%s4383_s27 + $0x50] sm:$0xff] }
  0x20   :  { %3119 = vmatmul.mubr.msk.f32.vlgmr.msra.gmra.mrb[2].mxu0 %vm190_vm5, %v178_v13  ;;  %v3408_v28 = vpack.c.bf16 %v280_v27, %v279_v26  ;;  %v282_v30 = vld [vmem:[%s4383_s27 + $0x58] sm:$0xff]  ;;  %v283_v32 = vld [vmem:[%s4383_s27 + $0x60] sm:$0xff]  ;;  %v284_v33 = vld [vmem:[%s4383_s27 + $0x68] sm:$0xff] }
  0x21   :  { %3153 = vmatprep.mubr.msk.f32.mxu0 %vm3642_vm4, %v3643_v12  ;;  %3397 = vmatpush3.bf16.msra.mxu0 %v3396_v16  ;;  %v3411_v31 = vpack.c.bf16 %v282_v30, %v281_v29  ;;  %v3414_v34 = vpack.c.bf16 %v284_v33, %v283_v32  ;;  %v285_v35 = vld [vmem:[%s4383_s27 + $0x70] sm:$0xff]  ;;  %v286_v36 = vld [vmem:[%s4383_s27 + $0x78] sm:$0xff]  ;;  %v2870_v40 = vld [vmem:[%s4384_s0] ss:$0 sm:$0xff]  ;;  %s4365_s0 = smov 16  }
  0x22   :  { %3398 = vmatprep.subr.bf16.mxu0 %v3641_v8  ;;  %v3417_v37 = vpack.c.bf16 %v286_v36, %v285_v35  ;;  %v2866_v51 = vld [vmem:[%s4385_s2] ss:$0 sm:$0xff]  ;;  %v423_v17 = vld [vmem:[%s4345_s11 + $0x8] sm:$0xff]  ;;  %v424_v18 = vld [vmem:[%s4345_s11 + $0x10] sm:$0xff] }
  0x23   :  { %v2873_v52 = vld [vmem:[%s4386_s7] ss:$0 sm:$0xff]  ;;  %v425_v20 = vld [vmem:[%s4345_s11 + $0x18] sm:$0xff] }
  0x24   :  { %v364_v57 = vld [vmem:[%s4387_s1] sm:$0xff]  ;;  %v3423_v21 = vpack.c.bf16 %v425_v20, %v424_v18 }
  0x25   :  { %3400 = vmatpush3.bf16.msra.mxu0 %v3399_v19  ;;  %v422_v16 = vld [vmem:[%s4345_s11] sm:$0xff] }
  0x26   :  { %3401 = vmatprep.subr.bf16.mxu0 %v3641_v8  ;;  %v3419_v19 = vpack.c.bf16 %v423_v17, %v422_v16  ;;  %v2874_v29 = vld [vmem:[%s4388_s30] ss:$0 sm:$0xff] }
  0x28   :  { %3420 = vmatprep.subr.bf16.mxu1 %v3419_v19 }
  0x29   :  { %3403 = vmatpush3.bf16.msra.mxu0 %v3402_v22  ;;  %3422 = vmatpush3.bf16.msra.mxu1 %v3419_v19 }
  0x2a   :  { %3404 = vmatprep.subr.bf16.mxu0 %v3641_v8  ;;  %3424 = vmatprep.subr.bf16.mxu1 %v3423_v21 }
  0x2d   :  { %3406 = vmatpush3.bf16.msra.mxu0 %v3405_v25  ;;  %3426 = vmatpush3.bf16.msra.mxu1 %v3423_v21 }
  0x2e   :  { %3407 = vmatprep.subr.bf16.mxu0 %v3641_v8  ;;  %3167 = vmatprep.subr.mxu1 %v3643_v12 }
  0x31   :  { %3409 = vmatpush3.bf16.msra.mxu0 %v3408_v28 }
  0x32   :  { %3410 = vmatprep.subr.bf16.mxu0 %v3641_v8 }
  0x35   :  { %3412 = vmatpush3.bf16.msra.mxu0 %v3411_v31  ;;  %v2875_v31 = vld [vmem:[%s4344_s10] ss:$0 sm:$0xff] }
  0x36   :  { %3413 = vmatprep.subr.bf16.mxu0 %v3641_v8 }
  0x39   :  { %3415 = vmatpush3.bf16.msra.mxu0 %v3414_v34 }
  0x3a   :  { %3416 = vmatprep.subr.bf16.mxu0 %v3641_v8 }
  0x3d   :  { %3418 = vmatpush3.bf16.msra.mxu0 %v3417_v37 }
  0x3e   :  { %3192 = vmatprep.subr.mxu0 %v3643_v12 }
  0xeb   :  { %v3109_v38 = vpop.f32.mrb[0].mxu0 }
  0xec   :  { %v169_v39 = vpop.f32.mrb[1].mxu0  ;;  %v175_v53 = vadd.f32 %v3109_v38, %v2866_v51  ;;  %v2876_v38 = vld [vmem:[%s4346_s12] ss:$0 sm:$0xff] }
  0xed   :  { %v170_v54 = vadd.f32 %v2866_v51, %v169_v39 }
  0xee   :  { %v374_v61 = vadd.f32 %v364_v57, %v175_v53 }
  0xef   :  { %v373_v62 = vadd.f32 %v364_v57, %v170_v54 }
  0xf3   :  { %v260_v41 = vpop.f32.mrb[2].mxu0 }
  0xf4   :  { %v261_v42 = vadd.f32 %v2870_v40, %v260_v41  ;;  %v3120_v43 = vpop.f32.mrb[3].mxu0 }
  0xf6   :  { %v2872_v44 = vmul.f32 -1.442695, %v261_v42 }
  0xf8   :  { %3552 = vpow2.f32 %v2872_v44 }
 0x102   :  { %v3553_v45 = vpop.eup %3552 }
 0x103   :  { %v267_v46 = vadd.f32 1.0, %v3553_v45 }
 0x105   :  { %3554 = vrcp.f32 %v267_v46 }
 0x10f   :  { %v3555_v47 = vpop.eup %3554 }
 0x110   :  { %v270_v48 = vmul.f32 %v3555_v47, %v261_v42 }
 0x112   :  { %3154 = vmatmul.mubr.f32.vlgmr.msra.gmra.mrb[4].mxu0 %v270_v48 }
 0x113   :  { %3194 = vmatprep.mubr.msk.f32.mxu0 %vm3642_vm4, %v3643_v12 }
 0x1e5   :  { %v360_v58 = vpop.f32.mrb[4].mxu0 }
 0x1e6   :  { %v361_v59 = vadd.f32 %v2873_v52, %v360_v58  ;;  %v3155_v60 = vpop.f32.mrb[5].mxu0 }
 0x1e8   :  { %v368_v63 = vrot.slane %v361_v59, %v367_v55  ;;  %v372_v0 = vrot.slane %v361_v59, %v371_v56 }
 0x1ea   :  { %v3880_v1 = vadd.f32 %v374_v61, %v372_v0  ;;  %v3882_v2 = vadd.f32 %v373_v62, %v368_v63 }
 0x1ec   :  { %v379_v3 = vsel %vm190_vm5, %v3882_v2, 0.0  ;;  %v382_v4 = vsel %vm190_vm5, %v3880_v1, 0.0 }
 0x1ed   :  { %380 = vadd.xlane.f32.xlu0 %v379_v3 }
 0x1f1   :  { %383 = vadd.xlane.f32.xlu0 %v382_v4 }
 0x27a   :  { %v381_v5 = vpop.xlane.xlu0 %380 }
 0x27b   :  { %v386_v6 = vmul.f32 0.03125, %v381_v5 }
 0x27d   :  { %v388_v7 = vsub.f32 %v3882_v2, %v386_v6 }
 0x27e   :  { %v384_v8 = vpop.xlane.xlu0 %383 }
 0x27f   :  { %v387_v9 = vmul.f32 0.03125, %v384_v8  ;;  %v390_v10 = vmul.f32 %v388_v7, %v388_v7 }
 0x281   :  { %v389_v11 = vsub.f32 %v3880_v1, %v387_v9  ;;  %v392_v13 = vsel %vm190_vm5, %v390_v10, 0.0 }
 0x282   :  { %393 = vadd.xlane.f32.xlu1 %v392_v13 }
 0x283   :  { %v391_v14 = vmul.f32 %v389_v11, %v389_v11 }
 0x285   :  { %v395_v15 = vsel %vm190_vm5, %v391_v14, 0.0 }
 0x286   :  { %396 = vadd.xlane.f32.xlu1 %v395_v15 }
 0x30f   :  { %v394_v22 = vpop.xlane.xlu1 %393 }
 0x310   :  { %v398_v23 = vmul.f32 0.03125, %v394_v22 }
 0x312   :  { %v400_v24 = vadd.f32 1e-05, %v398_v23 }
 0x313   :  { %v397_v25 = vpop.xlane.xlu1 %396 }
 0x314   :  { %3556 = vrsqrt.f32 %v400_v24  ;;  %v399_v26 = vmul.f32 0.03125, %v397_v25 }
 0x316   :  { %v401_v27 = vadd.f32 1e-05, %v399_v26 }
 0x318   :  { %3558 = vrsqrt.f32 %v401_v27 }
 0x31e   :  { %v3557_v28 = vpop.eup %3556 }
 0x31f   :  { %v404_v30 = vmul.f32 %v3557_v28, %v388_v7 }
 0x321   :  { %v412_v32 = vmul.f32 %v2874_v29, %v404_v30 }
 0x322   :  { %v3559_v33 = vpop.eup %3558 }
 0x323   :  { %v405_v34 = vmul.f32 %v3559_v33, %v389_v11  ;;  %v420_v35 = vadd.f32 %v2875_v31, %v412_v32 }
 0x325   :  { %v413_v36 = vmul.f32 %v2874_v29, %v405_v34  ;;  %3164 = vmatprep.mubr.msk.f32.mxu1 %vm190_vm5, %v420_v35 }
 0x327   :  { %v421_v37 = vadd.f32 %v2875_v31, %v413_v36 }
 0x329   :  { %3165 = vmatmul.mubr.msk.f32.vlgmr.msra.gmra.mrb[0].mxu1 %vm190_vm5, %v421_v37 }
 0x32a   :  { %3169 = vmatprep.mubr.msk.f32.mxu1 %vm3642_vm4, %v3643_v12 }
 0x3fc   :  { %v3166_v39 = vpop.f32.mrb[0].mxu1 }
 0x3fd   :  { %v3918_v40 = vadd.f32 %v3166_v39, %v2876_v38  ;;  %v505_v41 = vpop.f32.mrb[1].mxu1 }
 0x3fe   :  { %v506_v42 = vadd.f32 %v2876_v38, %v505_v41 }
 0x400   :  { %515 = vrot.lane.b32.xlu0 %v506_v42, %s3644_s8 }
 0x404   :  { %683 = vrot.lane.b32.xlu0 %v506_v42, %s3645_s4 }
 0x472   :  { %v516_v43 = vpop.permute.xlu0 %515 }
 0x473   :  { %3168 = vmatpush3.xpose.msk.msra.mxu1 %vm517_vm6, %v516_v43 }
 0x474   :  { %3172 = vmatprep.subr.mxu1 %v3643_v12 }
 0x476   :  { %3170 = vmatmul.mubr.msk.f32.vlgmr.msra.gmra.mrb[2].mxu1 %vm517_vm6, %v506_v42  ;;  %v684_v57 = vpop.permute.xlu0 %683 }
 0x477   :  { %3174 = vmatprep.mubr.msk.f32.mxu1 %vm3642_vm4, %v3643_v12 }
 0x549   :  { %v588_v44 = vpop.f32.mrb[2].mxu1 }
 0x54a   :  { %v592_v45 = vmul.f32 0.25, %v588_v44  ;;  %v3171_v46 = vpop.f32.mrb[3].mxu1 }
 0x54c   :  { %v594_v47 = vsel %vm593_vm7, %v592_v45, -inf }
 0x54d   :  { %595 = vmax.xlane.f32.xlu1 %v594_v47  ;;  %v1189_v47 = vld [vmem:[%s4347_s13 + $0x8] sm:$0xff] }
 0x55e   :  { %605 = vrot.lane.b32.xlu1 %v506_v42, %s3646_s28 }
 0x5da   :  { %v596_v48 = vpop.xlane.xlu1 %595 }
 0x5db   :  { %v597_v49 = vsub.f32 %v592_v45, %v596_v48  ;;  %v1190_v48 = vld [vmem:[%s4347_s13 + $0x10] sm:$0xff] }
 0x5dd   :  { %v598_v50 = vmul.f32 1.442695, %v597_v49 }
 0x5de   :  { %v606_v51 = vpop.permute.xlu1 %605 }
 0x5df   :  { %3560 = vpow2.f32 %v598_v50  ;;  %3173 = vmatpush3.msra.mxu1 %v606_v51  ;;  %v1191_v50 = vld [vmem:[%s4347_s13 + $0x18] sm:$0xff] }
 0x5e0   :  { %3177 = vmatprep.subr.mxu1 %v3643_v12  ;;  %v3431_v51 = vpack.c.bf16 %v1191_v50, %v1190_v48  ;;  %v1446_v48 = vld [vmem:[%s4353_s19 + $0x40] sm:$0xff] }
 0x5e9   :  { %v3561_v52 = vpop.eup %3560 }
 0x5ea   :  { %v600_v53 = vsel %vm593_vm7, %v3561_v52, 0.0 }
 0x5eb   :  { %601 = vadd.xlane.f32.xlu1 %v600_v53 }
 0x5fc   :  { %681 = vrot.lane.b32.xlu1 %v506_v42, %s3647_s9 }
 0x600   :  { %853 = vrot.lane.b32.xlu1 %v3918_v40, %s3644_s8 }
 0x678   :  { %v602_v54 = vpop.xlane.xlu1 %601 }
 0x679   :  { %3562 = vrcp.f32 %v602_v54 }
 0x67c   :  { %v682_v58 = vpop.permute.xlu1 %681 }
 0x680   :  { %v854_v9 = vpop.permute.xlu1 %853 }
 0x683   :  { %v3563_v55 = vpop.eup %3562 }
 0x684   :  { %v604_v56 = vmul.f32 %v3563_v55, %v3561_v52 }
 0x686   :  { %3175 = vmatmul.mubr.msk.f32.vlgmr.msra.gmra.mrb[4].mxu1 %vm593_vm7, %v604_v56 }
 0x687   :  { %3178 = vmatpush3.xpose.msk.msra.mxu1 %vm517_vm6, %v684_v57  ;;  %3179 = vmatprep.mubr.msk.f32.mxu1 %vm3642_vm4, %v3643_v12 }
 0x688   :  { %3182 = vmatprep.subr.mxu1 %v3643_v12 }
 0x68a   :  { %3180 = vmatmul.mubr.msk.f32.vlgmr.msra.gmra.mrb[6].mxu1 %vm517_vm6, %v682_v58 }
 0x68b   :  { %3184 = vmatprep.mubr.msk.f32.mxu1 %vm3642_vm4, %v3643_v12 }
 0x759   :  { %v677_v59 = vpop.f32.mrb[4].mxu1 }
 0x75a   :  { %v3176_v60 = vpop.f32.mrb[5].mxu1 }
 0x75d   :  { %v755_v61 = vpop.f32.mrb[6].mxu1 }
 0x75e   :  { %v759_v62 = vmul.f32 0.25, %v755_v61  ;;  %v3181_v63 = vpop.f32.mrb[7].mxu1 }
 0x760   :  { %v760_v0 = vsel %vm593_vm7, %v759_v62, -inf }
 0x761   :  { %761 = vmax.xlane.f32.xlu0 %v760_v0 }
 0x777   :  { %771 = vrot.lane.b32.xlu0 %v506_v42, %s4367_s5 }
 0x77b   :  { %1019 = vrot.lane.b32.xlu0 %v3918_v40, %s3645_s4 }
 0x7ee   :  { %v762_v3 = vpop.xlane.xlu0 %761 }
 0x7ef   :  { %v763_v4 = vsub.f32 %v759_v62, %v762_v3 }
 0x7f1   :  { %v764_v5 = vmul.f32 1.442695, %v763_v4 }
 0x7f2   :  { %v772_v6 = vpop.permute.xlu0 %771 }
 0x7f3   :  { %3564 = vpow2.f32 %v764_v5  ;;  %3183 = vmatpush3.msra.mxu1 %v772_v6 }
 0x7f4   :  { %3187 = vmatprep.subr.mxu1 %v3643_v12 }
 0x7f6   :  { %v1020_v14 = vpop.permute.xlu0 %1019 }
 0x7fd   :  { %v3565_v7 = vpop.eup %3564 }
 0x7fe   :  { %v766_v8 = vsel %vm593_vm7, %v3565_v7, 0.0 }
 0x7ff   :  { %767 = vadd.xlane.f32.xlu1 %v766_v8 }
 0x810   :  { %1017 = vrot.lane.b32.xlu1 %v3918_v40, %s3647_s9 }
 0x88c   :  { %v768_v10 = vpop.xlane.xlu1 %767 }
 0x88d   :  { %3566 = vrcp.f32 %v768_v10 }
 0x890   :  { %v1018_v15 = vpop.permute.xlu1 %1017 }
 0x897   :  { %v3567_v11 = vpop.eup %3566 }
 0x898   :  { %v770_v13 = vmul.f32 %v3567_v11, %v3565_v7 }
 0x89a   :  { %3185 = vmatmul.mubr.msk.f32.vlgmr.msra.gmra.mrb[8].mxu1 %vm593_vm7, %v770_v13 }
 0x89b   :  { %3188 = vmatpush3.xpose.msk.msra.mxu1 %vm517_vm6, %v854_v9  ;;  %3189 = vmatprep.mubr.msk.f32.mxu1 %vm3642_vm4, %v3643_v12 }
 0x89c   :  { %3197 = vmatprep.subr.mxu1 %v3643_v12 }
 0x89e   :  { %3190 = vmatmul.mubr.msk.f32.vlgmr.msra.gmra.mrb[10].mxu1 %vm517_vm6, %v3918_v40 }
 0x89f   :  { %3198 = vmatpush3.xpose.msk.msra.mxu1 %vm517_vm6, %v1020_v14  ;;  %3199 = vmatprep.mubr.msk.f32.mxu1 %vm3642_vm4, %v3643_v12  ;;  %v1328_v14 = vld [vmem:[%s4351_s17] sm:$0xff] }
 0x8a2   :  { %3200 = vmatmul.mubr.msk.f32.vlgmr.msra.gmra.mrb[12].mxu1 %vm517_vm6, %v1018_v15  ;;  %v1329_v15 = vld [vmem:[%s4351_s17 + $0x8] sm:$0xff] }
 0x96d   :  { %v843_v16 = vpop.f32.mrb[8].mxu1 }
 0x96e   :  { %v3186_v17 = vpop.f32.mrb[9].mxu1 }
 0x96f   :  { %v1330_v17 = vld [vmem:[%s4351_s17 + $0x10] sm:$0xff] }
 0x971   :  { %v925_v18 = vpop.f32.mrb[10].mxu1 }
 0x972   :  { %v929_v19 = vmul.f32 0.25, %v925_v18  ;;  %v3191_v20 = vpop.f32.mrb[11].mxu1  ;;  %v1331_v18 = vld [vmem:[%s4351_s17 + $0x18] sm:$0xff] }
 0x973   :  { %v1438_v20 = vld [vmem:[%s4353_s19] sm:$0xff] }
 0x974   :  { %v930_v21 = vsel %vm593_vm7, %v929_v19, -inf }
 0x975   :  { %931 = vmax.xlane.f32.xlu0 %v930_v21  ;;  %v1091_v22 = vpop.f32.mrb[12].mxu1  ;;  %v1439_v21 = vld [vmem:[%s4353_s19 + $0x8] sm:$0xff] }
 0x976   :  { %v1095_v23 = vmul.f32 0.25, %v1091_v22  ;;  %v3201_v24 = vpop.f32.mrb[13].mxu1  ;;  %v3443_v22 = vpack.c.bf16 %v1439_v21, %v1438_v20 }
 0x978   :  { %v1096_v25 = vsel %vm593_vm7, %v1095_v23, -inf }
 0x979   :  { %1097 = vmax.xlane.f32.xlu1 %v1096_v25 }
 0x98a   :  { %1107 = vrot.lane.b32.xlu1 %v3918_v40, %s4367_s5 }
 0x98e   :  { %848 = vrot.lane.b32.xlu1 %v843_v16, %s4365_s0  ;;  %v3435_v16 = vpack.c.bf16 %v1329_v15, %v1328_v14 }
 0xa02   :  { %v932_v26 = vpop.xlane.xlu0 %931 }
 0xa03   :  { %v933_v27 = vsub.f32 %v929_v19, %v932_v26  ;;  %v3439_v19 = vpack.c.bf16 %v1331_v18, %v1330_v17 }
 0xa05   :  { %v934_v28 = vmul.f32 1.442695, %v933_v27 }
 0xa06   :  { %v1098_v29 = vpop.xlane.xlu1 %1097 }
 0xa07   :  { %3568 = vpow2.f32 %v934_v28  ;;  %v1099_v30 = vsub.f32 %v1095_v23, %v1098_v29 }
 0xa09   :  { %v1100_v31 = vmul.f32 1.442695, %v1099_v30  ;;  %v2894_v30 = vld [vmem:[%s4349_s15] ss:$0 sm:$0xff] }
 0xa0a   :  { %v1108_v32 = vpop.permute.xlu1 %1107 }
 0xa0b   :  { %3570 = vpow2.f32 %v1100_v31 }
 0xa0e   :  { %v849_v33 = vpop.permute.xlu1 %848 }
 0xa0f   :  { %v851_v34 = vsel %vm517_vm6, %v677_v59, %v849_v33  ;;  %v2893_v59 = vld [vmem:[%s4348_s14] ss:$0 sm:$0xff] }
 0xa10   :  { %3215 = vmatprep.mubr.msk.f32.mxu1 %vm190_vm5, %v851_v34 }
 0xa11   :  { %v3569_v35 = vpop.eup %3568 }
 0xa12   :  { %v936_v36 = vsel %vm593_vm7, %v3569_v35, 0.0 }
 0xa13   :  { %937 = vadd.xlane.f32.xlu0 %v936_v36 }
 0xa15   :  { %v3571_v37 = vpop.eup %3570 }
 0xa16   :  { %v1102_v38 = vsel %vm593_vm7, %v3571_v37, 0.0 }
 0xa17   :  { %1103 = vadd.xlane.f32.xlu0 %v1102_v38 }
 0xa2d   :  { %941 = vrot.lane.b32.xlu0 %v3918_v40, %s3646_s28  ;;  %v1188_v40 = vld [vmem:[%s4347_s13] sm:$0xff] }
 0xa2e   :  { %v3427_v49 = vpack.c.bf16 %v1189_v47, %v1188_v40  ;;  %v1445_v40 = vld [vmem:[%s4353_s19 + $0x38] sm:$0xff] }
 0xa30   :  { %3428 = vmatprep.subr.bf16.mxu1 %v3427_v49 }
 0xa31   :  { %3430 = vmatpush3.bf16.msra.mxu1 %v3427_v49  ;;  %v1447_v49 = vld [vmem:[%s4353_s19 + $0x48] sm:$0xff] }
 0xa32   :  { %3432 = vmatprep.subr.bf16.mxu1 %v3431_v51  ;;  %v3459_v50 = vpack.c.bf16 %v1447_v49, %v1446_v48 }
 0xa35   :  { %3434 = vmatpush3.bf16.msra.mxu1 %v3431_v51  ;;  %v1448_v51 = vld [vmem:[%s4353_s19 + $0x50] sm:$0xff] }
 0xa36   :  { %3444 = vmatprep.subr.bf16.mxu1 %v3443_v22 }
 0xaa0   :  { %v938_v39 = vpop.xlane.xlu0 %937 }
 0xaa1   :  { %3572 = vrcp.f32 %v938_v39  ;;  %v1440_v39 = vld [vmem:[%s4353_s19 + $0x10] sm:$0xff] }
 0xaa4   :  { %v1104_v41 = vpop.xlane.xlu0 %1103 }
 0xaa5   :  { %3574 = vrcp.f32 %v1104_v41  ;;  %v1441_v41 = vld [vmem:[%s4353_s19 + $0x18] sm:$0xff] }
 0xaa8   :  { %v942_v42 = vpop.permute.xlu0 %941 }
 0xaa9   :  { %3193 = vmatpush3.msra.mxu0 %v942_v42  ;;  %v3447_v42 = vpack.c.bf16 %v1441_v41, %v1440_v39  ;;  %v2904_v39 = vld [vmem:[%s4345_s11 + $0x20] sm:$0xff]  ;;  %v2905_v41 = vld [vmem:[%s4345_s11 + $0x28] sm:$0xff] }
 0xaaa   :  { %3202 = vmatprep.subr.mxu0 %v3643_v12 }
 0xaab   :  { %v3573_v43 = vpop.eup %3572 }
 0xaac   :  { %v940_v44 = vmul.f32 %v3573_v43, %v3569_v35  ;;  %v1442_v43 = vld [vmem:[%s4353_s19 + $0x20] sm:$0xff] }
 0xaae   :  { %3195 = vmatmul.mubr.msk.f32.vlgmr.msra.gmra.mrb[6].mxu0 %vm593_vm7, %v940_v44  ;;  %v1443_v44 = vld [vmem:[%s4353_s19 + $0x28] sm:$0xff] }
 0xaaf   :  { %v3575_v45 = vpop.eup %3574  ;;  %3203 = vmatpush3.msra.mxu0 %v1108_v32  ;;  %3204 = vmatprep.mubr.msk.f32.mxu0 %vm3642_vm4, %v3643_v12  ;;  %v2895_v32 = vld [vmem:[%s4350_s16] ss:$0 sm:$0xff] }
 0xab0   :  { %v1106_v46 = vmul.f32 %v3575_v45, %v3571_v37  ;;  %3436 = vmatprep.subr.bf16.mxu0 %v3435_v16  ;;  %v3451_v45 = vpack.c.bf16 %v1443_v44, %v1442_v43  ;;  %v2906_v43 = vld [vmem:[%s4345_s11 + $0x30] sm:$0xff]  ;;  %v2907_v44 = vld [vmem:[%s4345_s11 + $0x38] sm:$0xff] }
 0xab2   :  { %3205 = vmatmul.mubr.msk.f32.vlgmr.msra.gmra.mrb[8].mxu0 %vm593_vm7, %v1106_v46  ;;  %v1444_v46 = vld [vmem:[%s4353_s19 + $0x30] sm:$0xff] }
 0xab3   :  { %3438 = vmatpush3.bf16.msra.mxu0 %v3435_v16  ;;  %v3455_v47 = vpack.c.bf16 %v1445_v40, %v1444_v46 }
 0xab4   :  { %3440 = vmatprep.subr.bf16.mxu0 %v3439_v19 }
 0xab7   :  { %3442 = vmatpush3.bf16.msra.mxu0 %v3439_v19 }
 0xb81   :  { %v1013_v52 = vpop.f32.mrb[6].mxu0 }
 0xb82   :  { %v3196_v53 = vpop.f32.mrb[7].mxu0 }
 0xb85   :  { %v1179_v54 = vpop.f32.mrb[8].mxu0 }
 0xb86   :  { %1184 = vrot.lane.b32.xlu1 %v1179_v54, %s4365_s0  ;;  %v3206_v55 = vpop.f32.mrb[9].mxu0  ;;  %v1450_v54 = vld [vmem:[%s4353_s19 + $0x60] sm:$0xff] }
 0xb87   :  { %v1451_v55 = vld [vmem:[%s4353_s19 + $0x68] sm:$0xff] }
 0xbf8   :  { %v1185_v56 = vpop.permute.xlu1 %1184 }
 0xbf9   :  { %v1187_v57 = vsel %vm517_vm6, %v1013_v52, %v1185_v56  ;;  %v1449_v52 = vld [vmem:[%s4353_s19 + $0x58] sm:$0xff]  ;;  %v3467_v56 = vpack.c.bf16 %v1451_v55, %v1450_v54 }
 0xbfa   :  { %3216 = vmatmul.mubr.msk.f32.vlgmr.msra.gmra.mrb[14].mxu1 %vm190_vm5, %v1187_v57  ;;  %v3463_v53 = vpack.c.bf16 %v1449_v52, %v1448_v51  ;;  %v1452_v57 = vld [vmem:[%s4353_s19 + $0x70] sm:$0xff]  ;;  %v2902_v52 = vld [vmem:[%s4388_s30 + $0x1] ss:$0 sm:$0xff] }
 0xbfb   :  { %3446 = vmatpush3.bf16.msra.mxu1 %v3443_v22 }
 0xbfc   :  { %3448 = vmatprep.subr.bf16.mxu1 %v3447_v42 }
 0xbff   :  { %3450 = vmatpush3.bf16.msra.mxu1 %v3447_v42  ;;  %v3475_v42 = vpack.c.bf16 %v2905_v41, %v2904_v39 }
 0xc00   :  { %3452 = vmatprep.subr.bf16.mxu1 %v3451_v45 }
 0xc01   :  { %3476 = vmatprep.subr.bf16.mxu0 %v3475_v42 }
 0xc03   :  { %3454 = vmatpush3.bf16.msra.mxu1 %v3451_v45  ;;  %v3479_v45 = vpack.c.bf16 %v2907_v44, %v2906_v43 }
 0xc04   :  { %3456 = vmatprep.subr.bf16.mxu1 %v3455_v47 }
 0xc07   :  { %3458 = vmatpush3.bf16.msra.mxu1 %v3455_v47 }
 0xc08   :  { %3460 = vmatprep.subr.bf16.mxu1 %v3459_v50 }
 0xc0b   :  { %3462 = vmatpush3.bf16.msra.mxu1 %v3459_v50 }
 0xc0c   :  { %3464 = vmatprep.subr.bf16.mxu1 %v3463_v53 }
 0xc0f   :  { %3466 = vmatpush3.bf16.msra.mxu1 %v3463_v53 }
 0xc10   :  { %3468 = vmatprep.subr.bf16.mxu1 %v3467_v56 }
 0xc13   :  { %3470 = vmatpush3.bf16.msra.mxu1 %v3467_v56  ;;  %v2903_v56 = vld [vmem:[%s4344_s10 + $0x1] ss:$0 sm:$0xff]  ;;  %s4389_s10 = smov 48  }
 0xccd   :  { %v3217_v58 = vpop.f32.mrb[14].mxu1 }
 0xcce   :  { %v1274_v60 = vadd.f32 %v3217_v58, %v3880_v1  ;;  %v1264_v61 = vpop.f32.mrb[15].mxu1  ;;  %v1453_v58 = vld [vmem:[%s4353_s19 + $0x78] sm:$0xff] }
 0xccf   :  { %v1273_v62 = vadd.f32 %v1264_v61, %v3882_v2 }
 0xcd0   :  { %v3997_v63 = vadd.f32 %v2893_v59, %v1274_v60  ;;  %v2896_v60 = vld [vmem:[%s4352_s18] ss:$0 sm:$0xff] }
 0xcd1   :  { %v3999_v0 = vadd.f32 %v2893_v59, %v1273_v62  ;;  %v3471_v59 = vpack.c.bf16 %v1453_v58, %v1452_v57 }
 0xcd2   :  { %v1289_v3 = vsel %vm190_vm5, %v3997_v63, 0.0 }
 0xcd3   :  { %1290 = vadd.xlane.f32.xlu1 %v1289_v3  ;;  %v1286_v4 = vsel %vm190_vm5, %v3999_v0, 0.0  ;;  %3472 = vmatprep.subr.bf16.mxu1 %v3471_v59 }
 0xcd4   :  { %1287 = vadd.xlane.f32.xlu0 %v1286_v4  ;;  %3474 = vmatpush3.bf16.msra.mxu1 %v3471_v59 }
 0xcd5   :  { %3305 = vmatprep.subr.mxu1 %v3643_v12 }
 0xd60   :  { %v1291_v5 = vpop.xlane.xlu1 %1290 }
 0xd61   :  { %v1293_v6 = vmul.f32 0.03125, %v1291_v5  ;;  %v1288_v7 = vpop.xlane.xlu0 %1287 }
 0xd62   :  { %v1292_v8 = vmul.f32 0.03125, %v1288_v7 }
 0xd63   :  { %v1295_v1 = vsub.f32 %v3997_v63, %v1293_v6 }
 0xd64   :  { %v1294_v2 = vsub.f32 %v3999_v0, %v1292_v8 }
 0xd65   :  { %v1297_v11 = vmul.f32 %v1295_v1, %v1295_v1 }
 0xd66   :  { %v1296_v9 = vmul.f32 %v1294_v2, %v1294_v2 }
 0xd67   :  { %v1301_v13 = vsel %vm190_vm5, %v1297_v11, 0.0 }
 0xd68   :  { %v1298_v10 = vsel %vm190_vm5, %v1296_v9, 0.0 }
 0xd69   :  { %1299 = vadd.xlane.f32.xlu0 %v1298_v10 }
 0xd6d   :  { %1302 = vadd.xlane.f32.xlu0 %v1301_v13 }
 0xdf6   :  { %v1300_v23 = vpop.xlane.xlu0 %1299 }
 0xdf7   :  { %v1304_v24 = vmul.f32 0.03125, %v1300_v23  ;;  %v2899_v23 = vld [vmem:[%s4354_s20] ss:$0 sm:$0xff] }
 0xdf9   :  { %v1306_v25 = vadd.f32 1e-05, %v1304_v24 }
 0xdfa   :  { %v1303_v26 = vpop.xlane.xlu0 %1302 }
 0xdfb   :  { %3576 = vrsqrt.f32 %v1306_v25  ;;  %v1305_v27 = vmul.f32 0.03125, %v1303_v26 }
 0xdfd   :  { %v1307_v28 = vadd.f32 1e-05, %v1305_v27 }
 0xdff   :  { %3578 = vrsqrt.f32 %v1307_v28 }
 0xe05   :  { %v3577_v29 = vpop.eup %3576 }
 0xe06   :  { %v1310_v31 = vmul.f32 %v3577_v29, %v1294_v2 }
 0xe08   :  { %v1318_v33 = vmul.f32 %v2894_v30, %v1310_v31 }
 0xe09   :  { %v3579_v34 = vpop.eup %3578 }
 0xe0a   :  { %v1311_v35 = vmul.f32 %v3579_v34, %v1295_v1  ;;  %v1326_v36 = vadd.f32 %v2895_v32, %v1318_v33 }
 0xe0c   :  { %v1319_v37 = vmul.f32 %v2894_v30, %v1311_v35  ;;  %3226 = vmatprep.mubr.msk.f32.mxu0 %vm190_vm5, %v1326_v36 }
 0xe0e   :  { %v1327_v38 = vadd.f32 %v2895_v32, %v1319_v37 }
 0xe10   :  { %3227 = vmatmul.mubr.msk.f32.vlgmr.msra.gmra.mrb[10].mxu0 %vm190_vm5, %v1327_v38 }
 0xe11   :  { %3478 = vmatpush3.bf16.msra.mxu0 %v3475_v42 }
 0xe12   :  { %3480 = vmatprep.subr.bf16.mxu0 %v3479_v45 }
 0xe15   :  { %3482 = vmatpush3.bf16.msra.mxu0 %v3479_v45 }
 0xe16   :  { %3275 = vmatprep.subr.mxu0 %v3643_v12 }
 0xee3   :  { %v3228_v61 = vpop.f32.mrb[10].mxu0 }
 0xee4   :  { %v1417_v62 = vadd.f32 %v3228_v61, %v2896_v60  ;;  %v1411_v3 = vpop.f32.mrb[11].mxu0  ;;  %v2909_v61 = vld [vmem:[%s4346_s12 + $0x1] ss:$0 sm:$0xff]  ;;  %s4390_s12 = smov 16  }
 0xee5   :  { %v1412_v4 = vadd.f32 %v2896_v60, %v1411_v3 }
 0xee6   :  { %v1423_v5 = vmul.f32 0.044715, %v1417_v62  ;;  %v1421_v19 = vmul.f32 0.5, %v1417_v62 }
 0xee7   :  { %v1422_v6 = vmul.f32 0.044715, %v1412_v4  ;;  %v1420_v17 = vmul.f32 0.5, %v1412_v4 }
 0xee8   :  { %v1425_v7 = vmul.f32 %v1423_v5, %v1417_v62 }
 0xee9   :  { %v1424_v8 = vmul.f32 %v1422_v6, %v1412_v4 }
 0xeea   :  { %v1427_v1 = vmul.f32 %v1425_v7, %v1417_v62 }
 0xeeb   :  { %v1426_v2 = vmul.f32 %v1424_v8, %v1412_v4 }
 0xeec   :  { %v1429_v9 = vadd.f32 %v1427_v1, %v1417_v62 }
 0xeed   :  { %v1428_v10 = vadd.f32 %v1426_v2, %v1412_v4 }
 0xeee   :  { %v1431_v11 = vmul.f32 0.7978846, %v1429_v9 }
 0xeef   :  { %v1430_v13 = vmul.f32 0.7978846, %v1428_v10 }
 0xef0   :  { %3580 = vtanh.f32 %v1431_v11 }
 0xef1   :  { %3582 = vtanh.f32 %v1430_v13 }
 0xefa   :  { %v3581_v14 = vpop.eup %3580 }
 0xefb   :  { %v3583_v15 = vpop.eup %3582  ;;  %v1435_v16 = vadd.f32 1.0, %v3581_v14 }
 0xefc   :  { %v1434_v18 = vadd.f32 1.0, %v3583_v15 }
 0xefd   :  { %v1437_v21 = vmul.f32 %v1435_v16, %v1421_v19 }
 0xefe   :  { %v1436_v20 = vmul.f32 %v1434_v18, %v1420_v17 }
 0xf00   :  { %3261 = vmatprep.mubr.f32.mxu1 %v1436_v20 }
 0xf01   :  { %3262 = vmatmul.mubr.f32.vlgmr.msra.gmra.mrb[16].mxu1 %v1437_v21 }
 0xf02   :  { %3307 = vmatprep.mubr.msk.f32.mxu1 %vm3642_vm4, %v3643_v12 }
 0xfd4   :  { %v3263_v22 = vpop.f32.mrb[16].mxu1 }
 0xfd5   :  { %v1530_v24 = vadd.f32 %v3263_v22, %v3997_v63  ;;  %v1520_v25 = vpop.f32.mrb[17].mxu1 }
 0xfd6   :  { %v1529_v26 = vadd.f32 %v1520_v25, %v3999_v0 }
 0xfd7   :  { %v4088_v27 = vadd.f32 %v2899_v23, %v1530_v24 }
 0xfd8   :  { %v4090_v28 = vadd.f32 %v2899_v23, %v1529_v26 }
 0xfd9   :  { %v1547_v29 = vsel %vm190_vm5, %v4088_v27, 0.0 }
 0xfda   :  { %1548 = vadd.xlane.f32.xlu1 %v1547_v29  ;;  %v1544_v30 = vsel %vm190_vm5, %v4090_v28, 0.0 }
 0xfdb   :  { %1545 = vadd.xlane.f32.xlu0 %v1544_v30 }
0x1067   :  { %v1549_v31 = vpop.xlane.xlu1 %1548 }
0x1068   :  { %v1551_v32 = vmul.f32 0.03125, %v1549_v31  ;;  %v1546_v33 = vpop.xlane.xlu0 %1545 }
0x1069   :  { %v1550_v34 = vmul.f32 0.03125, %v1546_v33 }
0x106a   :  { %v1553_v63 = vsub.f32 %v4088_v27, %v1551_v32 }
0x106b   :  { %v1552_v0 = vsub.f32 %v4090_v28, %v1550_v34 }
0x106c   :  { %v1555_v35 = vmul.f32 %v1553_v63, %v1553_v63 }
0x106d   :  { %v1554_v36 = vmul.f32 %v1552_v0, %v1552_v0 }
0x106e   :  { %v1559_v37 = vsel %vm190_vm5, %v1555_v35, 0.0 }
0x106f   :  { %1560 = vadd.xlane.f32.xlu1 %v1559_v37  ;;  %v1556_v38 = vsel %vm190_vm5, %v1554_v36, 0.0 }
0x1070   :  { %1557 = vadd.xlane.f32.xlu0 %v1556_v38 }
0x10fc   :  { %v1561_v46 = vpop.xlane.xlu1 %1560 }
0x10fd   :  { %v1563_v40 = vmul.f32 0.03125, %v1561_v46  ;;  %v1558_v47 = vpop.xlane.xlu0 %1557 }
0x10fe   :  { %v1562_v48 = vmul.f32 0.03125, %v1558_v47 }
0x10ff   :  { %v1565_v49 = vadd.f32 1e-05, %v1563_v40 }
0x1100   :  { %v1564_v50 = vadd.f32 1e-05, %v1562_v48 }
0x1101   :  { %3584 = vrsqrt.f32 %v1565_v49 }
0x1102   :  { %3586 = vrsqrt.f32 %v1564_v50 }
0x110b   :  { %v3585_v51 = vpop.eup %3584 }
0x110c   :  { %v3587_v53 = vpop.eup %3586  ;;  %v1569_v54 = vmul.f32 %v3585_v51, %v1553_v63 }
0x110d   :  { %v1568_v55 = vmul.f32 %v3587_v53, %v1552_v0 }
0x110e   :  { %v1577_v57 = vmul.f32 %v2902_v52, %v1569_v54 }
0x110f   :  { %v1576_v58 = vmul.f32 %v2902_v52, %v1568_v55 }
0x1110   :  { %v1585_v60 = vadd.f32 %v2903_v56, %v1577_v57 }
0x1111   :  { %v1584_v59 = vadd.f32 %v2903_v56, %v1576_v58 }
0x1113   :  { %3272 = vmatprep.mubr.msk.f32.mxu0 %vm190_vm5, %v1584_v59 }
0x1114   :  { %3273 = vmatmul.mubr.msk.f32.vlgmr.msra.gmra.mrb[12].mxu0 %vm190_vm5, %v1585_v60 }
0x1115   :  { %3277 = vmatprep.mubr.msk.f32.mxu0 %vm3642_vm4, %v3643_v12 }
0x11e7   :  { %v3274_v62 = vpop.f32.mrb[12].mxu0 }
0x11e8   :  { %v4126_v3 = vadd.f32 %v3274_v62, %v2909_v61  ;;  %v1671_v4 = vpop.f32.mrb[13].mxu0 }
0x11e9   :  { %v1672_v5 = vadd.f32 %v2909_v61, %v1671_v4 }
0x11eb   :  { %1681 = vrot.lane.b32.xlu0 %v1672_v5, %s3644_s8 }
0x11ef   :  { %1847 = vrot.lane.b32.xlu0 %v1672_v5, %s3645_s4 }
0x125d   :  { %v1682_v6 = vpop.permute.xlu0 %1681 }
0x125e   :  { %3276 = vmatpush3.xpose.msk.msra.mxu0 %vm517_vm6, %v1682_v6 }
0x125f   :  { %3280 = vmatprep.subr.mxu0 %v3643_v12 }
0x1261   :  { %3278 = vmatmul.mubr.msk.f32.vlgmr.msra.gmra.mrb[14].mxu0 %vm517_vm6, %v1672_v5  ;;  %v1848_v19 = vpop.permute.xlu0 %1847 }
0x1262   :  { %3282 = vmatprep.mubr.msk.f32.mxu0 %vm3642_vm4, %v3643_v12 }
0x1334   :  { %v1753_v7 = vpop.f32.mrb[14].mxu0 }
0x1335   :  { %v1757_v8 = vmul.f32 0.25, %v1753_v7  ;;  %v3279_v1 = vpop.f32.mrb[15].mxu0 }
0x1337   :  { %v1758_v2 = vsel %vm593_vm7, %v1757_v8, -inf }
0x1338   :  { %1759 = vmax.xlane.f32.xlu1 %v1758_v2  ;;  %v2925_v2 = vld [vmem:[%s4347_s13 + $0x28] sm:$0xff] }
0x1349   :  { %1769 = vrot.lane.b32.xlu1 %v1672_v5, %s3646_s28 }
0x13c5   :  { %v1760_v9 = vpop.xlane.xlu1 %1759 }
0x13c6   :  { %v1761_v10 = vsub.f32 %v1757_v8, %v1760_v9  ;;  %v2926_v9 = vld [vmem:[%s4347_s13 + $0x30] sm:$0xff] }
0x13c8   :  { %v1762_v11 = vmul.f32 1.442695, %v1761_v10 }
0x13c9   :  { %v1770_v13 = vpop.permute.xlu1 %1769 }
0x13ca   :  { %3588 = vpow2.f32 %v1762_v11  ;;  %3281 = vmatpush3.msra.mxu0 %v1770_v13 }
0x13cb   :  { %3285 = vmatprep.subr.mxu0 %v3643_v12 }
0x13d4   :  { %v3589_v14 = vpop.eup %3588 }
0x13d5   :  { %v1764_v15 = vsel %vm593_vm7, %v3589_v14, 0.0 }
0x13d6   :  { %1765 = vadd.xlane.f32.xlu1 %v1764_v15 }
0x13e7   :  { %1845 = vrot.lane.b32.xlu1 %v1672_v5, %s3647_s9 }
0x13eb   :  { %2017 = vrot.lane.b32.xlu1 %v4126_v3, %s3644_s8 }
0x1463   :  { %v1766_v16 = vpop.xlane.xlu1 %1765 }
0x1464   :  { %3590 = vrcp.f32 %v1766_v16 }
0x1467   :  { %v1846_v20 = vpop.permute.xlu1 %1845 }
0x146b   :  { %v2018_v0 = vpop.permute.xlu1 %2017 }
0x146e   :  { %v3591_v17 = vpop.eup %3590 }
0x146f   :  { %v1768_v18 = vmul.f32 %v3591_v17, %v3589_v14 }
0x1471   :  { %3283 = vmatmul.mubr.msk.f32.vlgmr.msra.gmra.mrb[16].mxu0 %vm593_vm7, %v1768_v18 }
0x1472   :  { %3286 = vmatpush3.xpose.msk.msra.mxu0 %vm517_vm6, %v1848_v19  ;;  %3287 = vmatprep.mubr.msk.f32.mxu0 %vm3642_vm4, %v3643_v12 }
0x1473   :  { %3290 = vmatprep.subr.mxu0 %v3643_v12 }
0x1475   :  { %3288 = vmatmul.mubr.msk.f32.vlgmr.msra.gmra.mrb[18].mxu0 %vm517_vm6, %v1846_v20  ;;  %v2931_v20 = vld [vmem:[%s4348_s14 + $0x1] ss:$0 sm:$0xff] }
0x1476   :  { %3292 = vmatprep.mubr.msk.f32.mxu0 %vm3642_vm4, %v3643_v12 }
0x1544   :  { %v1841_v21 = vpop.f32.mrb[16].mxu0 }
0x1545   :  { %v3284_v22 = vpop.f32.mrb[17].mxu0 }
0x1548   :  { %v1919_v23 = vpop.f32.mrb[18].mxu0 }
0x1549   :  { %v1923_v24 = vmul.f32 0.25, %v1919_v23  ;;  %v3289_v25 = vpop.f32.mrb[19].mxu0 }
0x154b   :  { %v1924_v26 = vsel %vm593_vm7, %v1923_v24, -inf }
0x154c   :  { %1925 = vmax.xlane.f32.xlu0 %v1924_v26 }
0x1562   :  { %1935 = vrot.lane.b32.xlu0 %v1672_v5, %s4389_s10 }
0x1566   :  { %2183 = vrot.lane.b32.xlu0 %v4126_v3, %s3645_s4 }
0x15d9   :  { %v1926_v29 = vpop.xlane.xlu0 %1925 }
0x15da   :  { %v1927_v30 = vsub.f32 %v1923_v24, %v1926_v29 }
0x15dc   :  { %v1928_v31 = vmul.f32 1.442695, %v1927_v30 }
0x15dd   :  { %v1936_v32 = vpop.permute.xlu0 %1935 }
0x15de   :  { %3592 = vpow2.f32 %v1928_v31  ;;  %3291 = vmatpush3.msra.mxu0 %v1936_v32 }
0x15df   :  { %3295 = vmatprep.subr.mxu0 %v3643_v12 }
0x15e1   :  { %v2184_v33 = vpop.permute.xlu0 %2183 }
0x15e2   :  { %3306 = vmatpush3.xpose.msk.msra.mxu1 %vm517_vm6, %v2184_v33 }
0x15e8   :  { %v3593_v34 = vpop.eup %3592 }
0x15e9   :  { %v1930_v63 = vsel %vm593_vm7, %v3593_v34, 0.0 }
0x15ea   :  { %1931 = vadd.xlane.f32.xlu1 %v1930_v63 }
0x15fb   :  { %2181 = vrot.lane.b32.xlu1 %v4126_v3, %s3647_s9 }
0x1677   :  { %v1932_v35 = vpop.xlane.xlu1 %1931 }
0x1678   :  { %3594 = vrcp.f32 %v1932_v35 }
0x167b   :  { %v2182_v36 = vpop.permute.xlu1 %2181 }
0x167c   :  { %3308 = vmatmul.mubr.msk.f32.vlgmr.msra.gmra.mrb[18].mxu1 %vm517_vm6, %v2182_v36  ;;  %v2936_v36 = vld [vmem:[%s4351_s17 + $0x20] sm:$0xff] }
0x1682   :  { %v3595_v37 = vpop.eup %3594 }
0x1683   :  { %v1934_v38 = vmul.f32 %v3595_v37, %v3593_v34  ;;  %v2937_v37 = vld [vmem:[%s4351_s17 + $0x28] sm:$0xff] }
0x1685   :  { %3293 = vmatmul.mubr.msk.f32.vlgmr.msra.gmra.mrb[20].mxu0 %vm593_vm7, %v1934_v38  ;;  %v3491_v38 = vpack.c.bf16 %v2937_v37, %v2936_v36 }
0x1686   :  { %3296 = vmatpush3.xpose.msk.msra.mxu0 %vm517_vm6, %v2018_v0  ;;  %3297 = vmatprep.mubr.msk.f32.mxu0 %vm3642_vm4, %v3643_v12 }
0x1687   :  { %3300 = vmatprep.subr.mxu0 %v3643_v12 }
0x1689   :  { %3298 = vmatmul.mubr.msk.f32.vlgmr.msra.gmra.mrb[22].mxu0 %vm517_vm6, %v4126_v3 }
0x168a   :  { %3302 = vmatprep.mubr.msk.f32.mxu0 %vm3642_vm4, %v3643_v12 }
0x174f   :  { %v2255_v39 = vpop.f32.mrb[18].mxu1 }
0x1750   :  { %v2259_v41 = vmul.f32 0.25, %v2255_v39  ;;  %v3309_v42 = vpop.f32.mrb[19].mxu1  ;;  %v2938_v39 = vld [vmem:[%s4351_s17 + $0x30] sm:$0xff] }
0x1752   :  { %v2260_v43 = vsel %vm593_vm7, %v2259_v41, -inf }
0x1753   :  { %2261 = vmax.xlane.f32.xlu1 %v2260_v43  ;;  %v2944_v43 = vld [vmem:[%s4353_s19 + $0x80] sm:$0xff] }
0x1758   :  { %v2007_v44 = vpop.f32.mrb[20].mxu0 }
0x1759   :  { %v3294_v45 = vpop.f32.mrb[21].mxu0 }
0x175c   :  { %v2089_v46 = vpop.f32.mrb[22].mxu0 }
0x175d   :  { %v2093_v40 = vmul.f32 0.25, %v2089_v46  ;;  %v3299_v47 = vpop.f32.mrb[23].mxu0 }
0x175f   :  { %v2094_v48 = vsel %vm593_vm7, %v2093_v40, -inf }
0x1760   :  { %2095 = vmax.xlane.f32.xlu0 %v2094_v48 }
0x1764   :  { %2271 = vrot.lane.b32.xlu1 %v4126_v3, %s4389_s10 }
0x1768   :  { %2012 = vrot.lane.b32.xlu1 %v2007_v44, %s4390_s12  ;;  %v2945_v44 = vld [vmem:[%s4353_s19 + $0x88] sm:$0xff] }
0x1769   :  { %v3499_v45 = vpack.c.bf16 %v2945_v44, %v2944_v43 }
0x17e0   :  { %v2262_v49 = vpop.xlane.xlu1 %2261 }
0x17e1   :  { %v2263_v50 = vsub.f32 %v2259_v41, %v2262_v49  ;;  %v2939_v41 = vld [vmem:[%s4351_s17 + $0x38] sm:$0xff] }
0x17e2   :  { %v3495_v42 = vpack.c.bf16 %v2939_v41, %v2938_v39 }
0x17e3   :  { %v2264_v51 = vmul.f32 1.442695, %v2263_v50 }
0x17e4   :  { %v2272_v52 = vpop.permute.xlu1 %2271 }
0x17e5   :  { %3596 = vpow2.f32 %v2264_v51 }
0x17e8   :  { %v2013_v53 = vpop.permute.xlu1 %2012 }
0x17e9   :  { %v2015_v54 = vsel %vm517_vm6, %v1841_v21, %v2013_v53 }
0x17ea   :  { %3323 = vmatprep.mubr.msk.f32.mxu1 %vm190_vm5, %v2015_v54  ;;  %v2935_v54 = vld [vmem:[%s4350_s16 + $0x1] ss:$0 sm:$0xff] }
0x17ed   :  { %v2096_v55 = vpop.xlane.xlu0 %2095 }
0x17ee   :  { %v2097_v56 = vsub.f32 %v2093_v40, %v2096_v55 }
0x17ef   :  { %v3597_v57 = vpop.eup %3596 }
0x17f0   :  { %v2098_v58 = vmul.f32 1.442695, %v2097_v56  ;;  %v2266_v59 = vsel %vm593_vm7, %v3597_v57, 0.0 }
0x17f1   :  { %2267 = vadd.xlane.f32.xlu0 %v2266_v59 }
0x17f2   :  { %3598 = vpow2.f32 %v2098_v58 }
0x17fc   :  { %v3599_v60 = vpop.eup %3598 }
0x17fd   :  { %v2100_v61 = vsel %vm593_vm7, %v3599_v60, 0.0 }
0x17fe   :  { %2101 = vadd.xlane.f32.xlu0 %v2100_v61  ;;  %v2946_v61 = vld [vmem:[%s4353_s19 + $0x90] sm:$0xff] }
0x1814   :  { %2105 = vrot.lane.b32.xlu0 %v4126_v3, %s3646_s28  ;;  %v2924_v3 = vld [vmem:[%s4347_s13 + $0x20] sm:$0xff] }
0x1815   :  { %v3483_v10 = vpack.c.bf16 %v2925_v2, %v2924_v3  ;;  %v2952_v2 = vld [vmem:[%s4353_s19 + $0xc0] sm:$0xff] }
0x1817   :  { %3484 = vmatprep.subr.bf16.mxu1 %v3483_v10 }
0x1818   :  { %3486 = vmatpush3.bf16.msra.mxu1 %v3483_v10 }
0x187e   :  { %v2268_v62 = vpop.xlane.xlu0 %2267 }
0x188b   :  { %v2102_v4 = vpop.xlane.xlu0 %2101 }
0x188c   :  { %3600 = vrcp.f32 %v2102_v4 }
0x188d   :  { %3602 = vrcp.f32 %v2268_v62  ;;  %v2947_v62 = vld [vmem:[%s4353_s19 + $0x98] sm:$0xff] }
0x188e   :  { %v3503_v4 = vpack.c.bf16 %v2947_v62, %v2946_v61  ;;  %v2757_v61 = vld [vmem:[%s4357_s23 + $0x8] sm:$0xff] }
0x188f   :  { %v2106_v5 = vpop.permute.xlu0 %2105 }
0x1890   :  { %3301 = vmatpush3.msra.mxu0 %v2106_v5  ;;  %v2948_v5 = vld [vmem:[%s4353_s19 + $0xa0] sm:$0xff] }
0x1891   :  { %3310 = vmatprep.subr.mxu0 %v3643_v12 }
0x1896   :  { %v3601_v6 = vpop.eup %3600 }
0x1897   :  { %v2104_v7 = vmul.f32 %v3601_v6, %v3599_v60  ;;  %v3603_v8 = vpop.eup %3602  ;;  %v2949_v6 = vld [vmem:[%s4353_s19 + $0xa8] sm:$0xff] }
0x1898   :  { %v2270_v1 = vmul.f32 %v3603_v8, %v3597_v57  ;;  %v2950_v8 = vld [vmem:[%s4353_s19 + $0xb0] sm:$0xff] }
0x1899   :  { %3303 = vmatmul.mubr.msk.f32.vlgmr.msra.gmra.mrb[24].mxu0 %vm593_vm7, %v2104_v7  ;;  %v3507_v7 = vpack.c.bf16 %v2949_v6, %v2948_v5  ;;  %v2759_v5 = vld [vmem:[%s4357_s23 + $0x18] sm:$0xff] }
0x189a   :  { %3311 = vmatpush3.msra.mxu0 %v2272_v52  ;;  %3312 = vmatprep.mubr.msk.f32.mxu0 %vm3642_vm4, %v3643_v12  ;;  %v2927_v12 = vld [vmem:[%s4347_s13 + $0x38] sm:$0xff]  ;;  %v2934_v52 = vld [vmem:[%s4349_s15 + $0x1] ss:$0 sm:$0xff] }
0x189b   :  { %v3487_v11 = vpack.c.bf16 %v2927_v12, %v2926_v9  ;;  %3492 = vmatprep.subr.bf16.mxu0 %v3491_v38  ;;  %v2953_v9 = vld [vmem:[%s4353_s19 + $0xc8] sm:$0xff]  ;;  %v2954_v12 = vld [vmem:[%s4353_s19 + $0xd0] sm:$0xff] }
0x189c   :  { %v3515_v10 = vpack.c.bf16 %v2953_v9, %v2952_v2 }
0x189d   :  { %3313 = vmatmul.mubr.msk.f32.vlgmr.msra.gmra.mrb[26].mxu0 %vm593_vm7, %v2270_v1  ;;  %3488 = vmatprep.subr.bf16.mxu1 %v3487_v11  ;;  %v2951_v1 = vld [vmem:[%s4353_s19 + $0xb8] sm:$0xff] }
0x189e   :  { %3490 = vmatpush3.bf16.msra.mxu1 %v3487_v11  ;;  %3494 = vmatpush3.bf16.msra.mxu0 %v3491_v38  ;;  %v3511_v3 = vpack.c.bf16 %v2951_v1, %v2950_v8  ;;  %v2955_v11 = vld [vmem:[%s4353_s19 + $0xd8] sm:$0xff] }
0x189f   :  { %3496 = vmatprep.subr.bf16.mxu0 %v3495_v42  ;;  %3500 = vmatprep.subr.bf16.mxu1 %v3499_v45 }
0x18a2   :  { %3498 = vmatpush3.bf16.msra.mxu0 %v3495_v42 }
0x196c   :  { %v2177_v13 = vpop.f32.mrb[24].mxu0 }
0x196d   :  { %v3304_v14 = vpop.f32.mrb[25].mxu0 }
0x196e   :  { %v2956_v14 = vld [vmem:[%s4353_s19 + $0xe0] sm:$0xff] }
0x1970   :  { %v2343_v15 = vpop.f32.mrb[26].mxu0 }
0x1971   :  { %2348 = vrot.lane.b32.xlu1 %v2343_v15, %s4390_s12  ;;  %v3314_v16 = vpop.f32.mrb[27].mxu0  ;;  %v2957_v15 = vld [vmem:[%s4353_s19 + $0xe8] sm:$0xff] }
0x1972   :  { %v3523_v16 = vpack.c.bf16 %v2957_v15, %v2956_v14  ;;  %v2963_v15 = vld [vmem:[%s4356_s22] ss:$0 sm:$0xff] }
0x19e3   :  { %v2349_v17 = vpop.permute.xlu1 %2348 }
0x19e4   :  { %v2351_v18 = vsel %vm517_vm6, %v2177_v13, %v2349_v17  ;;  %v3519_v13 = vpack.c.bf16 %v2955_v11, %v2954_v12  ;;  %v2958_v17 = vld [vmem:[%s4353_s19 + $0xf0] sm:$0xff]  ;;  %v2962_v12 = vld [vmem:[%s4355_s21] ss:$0 sm:$0xff]  ;;  %s3650_s21 = smov [#allocation2]  }
0x19e5   :  { %3324 = vmatmul.mubr.msk.f32.vlgmr.msra.gmra.mrb[20].mxu1 %vm190_vm5, %v2351_v18  ;;  %v2959_v18 = vld [vmem:[%s4353_s19 + $0xf8] sm:$0xff]  ;;  %s2855_s17 = sshll.u32 %s3650_s21, 4  ;;  %s2856_s17 = int_to_ptr.vmem [resolvable:$true] %s2855_s17 }
0x19e6   :  { %3502 = vmatpush3.bf16.msra.mxu1 %v3499_v45  ;;  %v2961_v45 = vld [vmem:[%s4354_s20 + $0x1] ss:$0 sm:$0xff]  ;;  %s3616_s22 = scalar_lea.vmem %s2856_s17, 256  ;;  %p3621_p1 = scmp.lt.s32.totalorder %s2856_s17, %s2856_s17 }
0x19e7   :  { %3504 = vmatprep.subr.bf16.mxu1 %v3503_v4  ;;  %p3617_p0 = scmp.ne.s32.totalorder %s2856_s17, %s3616_s22  ;;  %p3622_p2 = scmp.lt.s32.totalorder %s3616_s22, %s3616_s22 }
0x19e9   :  { %p3623_p3 = por %p3622_p2, %p3621_p1 }
0x19ea   :  { %3506 = vmatpush3.bf16.msra.mxu1 %v3503_v4  ;;  %v2758_v4 = vld [vmem:[%s4357_s23 + $0x10] sm:$0xff] }
0x19eb   :  { %3508 = vmatprep.subr.bf16.mxu1 %v3507_v7  ;;  %v3535_v6 = vpack.c.bf16 %v2759_v5, %v2758_v4  ;;  %p3624_p4 = pnand %p3623_p3, %p3617_p0 }
0x19ee   :  { %3510 = vmatpush3.bf16.msra.mxu1 %v3507_v7 }
0x19ef   :  { %3512 = vmatprep.subr.bf16.mxu1 %v3511_v3 }
0x19f2   :  { %3514 = vmatpush3.bf16.msra.mxu1 %v3511_v3 }
0x19f3   :  { %3516 = vmatprep.subr.bf16.mxu1 %v3515_v10 }
0x19f6   :  { %3518 = vmatpush3.bf16.msra.mxu1 %v3515_v10 }
0x19f7   :  { %3520 = vmatprep.subr.bf16.mxu1 %v3519_v13 }
0x19fa   :  { %3522 = vmatpush3.bf16.msra.mxu1 %v3519_v13 }
0x19fb   :  { %3524 = vmatprep.subr.bf16.mxu1 %v3523_v16 }
0x19fe   :  { %3526 = vmatpush3.bf16.msra.mxu1 %v3523_v16 }
0x1ab8   :  { %v3325_v19 = vpop.f32.mrb[20].mxu1 }
0x1ab9   :  { %v2439_v21 = vadd.f32 %v3325_v19, %v4088_v27  ;;  %v2429_v22 = vpop.f32.mrb[21].mxu1  ;;  %v3527_v19 = vpack.c.bf16 %v2959_v18, %v2958_v17 }
0x1aba   :  { %v2438_v23 = vadd.f32 %v2429_v22, %v4090_v28 }
0x1abb   :  { %v4205_v24 = vadd.f32 %v2931_v20, %v2439_v21  ;;  %3528 = vmatprep.subr.bf16.mxu1 %v3527_v19 }
0x1abc   :  { %v4207_v25 = vadd.f32 %v2931_v20, %v2438_v23  ;;  %3530 = vmatpush3.bf16.msra.mxu1 %v3527_v19  ;;  %v2941_v20 = vld [vmem:[%s4352_s18 + $0x1] ss:$0 sm:$0xff] }
0x1abd   :  { %v2457_v26 = vsel %vm190_vm5, %v4205_v24, 0.0 }
0x1abe   :  { %2458 = vadd.xlane.f32.xlu1 %v2457_v26  ;;  %v2454_v29 = vsel %vm190_vm5, %v4207_v25, 0.0 }
0x1abf   :  { %2455 = vadd.xlane.f32.xlu0 %v2454_v29 }
0x1b4b   :  { %v2459_v30 = vpop.xlane.xlu1 %2458 }
0x1b4c   :  { %v2461_v31 = vmul.f32 0.03125, %v2459_v30  ;;  %v2456_v32 = vpop.xlane.xlu0 %2455 }
0x1b4d   :  { %v2460_v33 = vmul.f32 0.03125, %v2456_v32 }
0x1b4e   :  { %v2463_v27 = vsub.f32 %v4205_v24, %v2461_v31 }
0x1b4f   :  { %v2462_v28 = vsub.f32 %v4207_v25, %v2460_v33 }
0x1b50   :  { %v2465_v0 = vmul.f32 %v2463_v27, %v2463_v27 }
0x1b51   :  { %v2464_v34 = vmul.f32 %v2462_v28, %v2462_v28 }
0x1b52   :  { %v2469_v35 = vsel %vm190_vm5, %v2465_v0, 0.0 }
0x1b53   :  { %v2466_v63 = vsel %vm190_vm5, %v2464_v34, 0.0 }
0x1b54   :  { %2467 = vadd.xlane.f32.xlu0 %v2466_v63 }
0x1b58   :  { %2470 = vadd.xlane.f32.xlu0 %v2469_v35 }
0x1be1   :  { %v2468_v46 = vpop.xlane.xlu0 %2467 }
0x1be2   :  { %v2472_v40 = vmul.f32 0.03125, %v2468_v46 }
0x1be4   :  { %v2474_v47 = vadd.f32 1e-05, %v2472_v40 }
0x1be5   :  { %v2471_v48 = vpop.xlane.xlu0 %2470 }
0x1be6   :  { %3604 = vrsqrt.f32 %v2474_v47  ;;  %v2473_v49 = vmul.f32 0.03125, %v2471_v48 }
0x1be8   :  { %v2475_v50 = vadd.f32 1e-05, %v2473_v49 }
0x1bea   :  { %3606 = vrsqrt.f32 %v2475_v50 }
0x1bf0   :  { %v3605_v51 = vpop.eup %3604 }
0x1bf1   :  { %v2478_v53 = vmul.f32 %v3605_v51, %v2462_v28 }
0x1bf3   :  { %v2486_v55 = vmul.f32 %v2934_v52, %v2478_v53 }
0x1bf4   :  { %v3607_v56 = vpop.eup %3606 }
0x1bf5   :  { %v2479_v57 = vmul.f32 %v3607_v56, %v2463_v27  ;;  %v2494_v58 = vadd.f32 %v2935_v54, %v2486_v55 }
0x1bf7   :  { %v2487_v59 = vmul.f32 %v2934_v52, %v2479_v57  ;;  %3334 = vmatprep.mubr.msk.f32.mxu0 %vm190_vm5, %v2494_v58 }
0x1bf9   :  { %v2495_v60 = vadd.f32 %v2935_v54, %v2487_v59 }
0x1bfb   :  { %3335 = vmatmul.mubr.msk.f32.vlgmr.msra.gmra.mrb[28].mxu0 %vm190_vm5, %v2495_v60  ;;  %v2756_v60 = vld [vmem:[%s4357_s23] sm:$0xff] }
0x1bfc   :  { %v3531_v62 = vpack.c.bf16 %v2757_v61, %v2756_v60 }
0x1bfe   :  { %3532 = vmatprep.subr.bf16.mxu0 %v3531_v62 }
0x1bff   :  { %3534 = vmatpush3.bf16.msra.mxu0 %v3531_v62 }
0x1c00   :  { %3536 = vmatprep.subr.bf16.mxu0 %v3535_v6 }
0x1c03   :  { %3538 = vmatpush3.bf16.msra.mxu0 %v3535_v6 }
0x1cce   :  { %v3336_v21 = vpop.f32.mrb[28].mxu0 }
0x1ccf   :  { %v2587_v22 = vadd.f32 %v3336_v21, %v2941_v20  ;;  %v2581_v23 = vpop.f32.mrb[29].mxu0 }
0x1cd0   :  { %v2582_v26 = vadd.f32 %v2941_v20, %v2581_v23  ;;  %v2964_v20 = vld [vmem:[%s4358_s24] ss:$0 sm:$0xff] }
0x1cd1   :  { %v2593_v29 = vmul.f32 0.044715, %v2587_v22  ;;  %v2591_v41 = vmul.f32 0.5, %v2587_v22 }
0x1cd2   :  { %v2592_v30 = vmul.f32 0.044715, %v2582_v26  ;;  %v2590_v38 = vmul.f32 0.5, %v2582_v26 }
0x1cd3   :  { %v2595_v31 = vmul.f32 %v2593_v29, %v2587_v22 }
0x1cd4   :  { %v2594_v32 = vmul.f32 %v2592_v30, %v2582_v26 }
0x1cd5   :  { %v2597_v33 = vmul.f32 %v2595_v31, %v2587_v22 }
0x1cd6   :  { %v2596_v27 = vmul.f32 %v2594_v32, %v2582_v26 }
0x1cd7   :  { %v2599_v28 = vadd.f32 %v2597_v33, %v2587_v22 }
0x1cd8   :  { %v2598_v34 = vadd.f32 %v2596_v27, %v2582_v26 }
0x1cd9   :  { %v2601_v63 = vmul.f32 0.7978846, %v2599_v28 }
0x1cda   :  { %v2600_v0 = vmul.f32 0.7978846, %v2598_v34 }
0x1cdb   :  { %3608 = vtanh.f32 %v2601_v63 }
0x1cdc   :  { %3610 = vtanh.f32 %v2600_v0 }
0x1ce5   :  { %v3609_v35 = vpop.eup %3608 }
0x1ce6   :  { %v3611_v36 = vpop.eup %3610  ;;  %v2605_v37 = vadd.f32 1.0, %v3609_v35 }
0x1ce7   :  { %v2604_v39 = vadd.f32 1.0, %v3611_v36 }
0x1ce8   :  { %v2607_v43 = vmul.f32 %v2605_v37, %v2591_v41 }
0x1ce9   :  { %v2606_v42 = vmul.f32 %v2604_v39, %v2590_v38 }
0x1ceb   :  { %3369 = vmatprep.mubr.f32.mxu1 %v2606_v42 }
0x1cec   :  { %3370 = vmatmul.mubr.f32.vlgmr.msra.gmra.mrb[22].mxu1 %v2607_v43 }
0x1dbf   :  { %v3371_v44 = vpop.f32.mrb[22].mxu1 }
0x1dc0   :  { %v2701_v46 = vadd.f32 %v3371_v44, %v4205_v24  ;;  %v2691_v40 = vpop.f32.mrb[23].mxu1 }
0x1dc1   :  { %v2700_v47 = vadd.f32 %v2691_v40, %v4207_v25 }
0x1dc2   :  { %v2711_v48 = vadd.f32 %v2961_v45, %v2701_v46 }
0x1dc3   :  { %v2710_v49 = vadd.f32 %v2961_v45, %v2700_v47 }
0x1dc4   :  { %v2717_v50 = vsel %vm190_vm5, %v2711_v48, 0.0 }
0x1dc5   :  { %2718 = vadd.xlane.f32.xlu1 %v2717_v50  ;;  %v2714_v51 = vsel %vm190_vm5, %v2710_v49, 0.0 }
0x1dc6   :  { %2715 = vadd.xlane.f32.xlu0 %v2714_v51 }
0x1e52   :  { %v2719_v52 = vpop.xlane.xlu1 %2718 }
0x1e53   :  { %v2721_v53 = vmul.f32 0.03125, %v2719_v52  ;;  %v2716_v54 = vpop.xlane.xlu0 %2715 }
0x1e54   :  { %v2720_v55 = vmul.f32 0.03125, %v2716_v54 }
0x1e55   :  { %v2723_v56 = vsub.f32 %v2711_v48, %v2721_v53 }
0x1e56   :  { %v2722_v57 = vsub.f32 %v2710_v49, %v2720_v55 }
0x1e57   :  { %v2725_v58 = vmul.f32 %v2723_v56, %v2723_v56 }
0x1e58   :  { %v2724_v59 = vmul.f32 %v2722_v57, %v2722_v57 }
0x1e59   :  { %v2729_v24 = vsel %vm190_vm5, %v2725_v58, 0.0 }
0x1e5a   :  { %2730 = vadd.xlane.f32.xlu1 %v2729_v24  ;;  %v2726_v25 = vsel %vm190_vm5, %v2724_v59, 0.0 }
0x1e5b   :  { %2727 = vadd.xlane.f32.xlu0 %v2726_v25 }
0x1ee7   :  { %v2731_v7 = vpop.xlane.xlu1 %2730 }
0x1ee8   :  { %v2733_v8 = vmul.f32 0.03125, %v2731_v7  ;;  %v2728_v1 = vpop.xlane.xlu0 %2727 }
0x1ee9   :  { %v2732_v3 = vmul.f32 0.03125, %v2728_v1 }
0x1eea   :  { %v2735_v2 = vadd.f32 1e-05, %v2733_v8 }
0x1eeb   :  { %v2734_v9 = vadd.f32 1e-05, %v2732_v3 }
0x1eec   :  { %3612 = vrsqrt.f32 %v2735_v2 }
0x1eed   :  { %3614 = vrsqrt.f32 %v2734_v9 }
0x1ef6   :  { %v3613_v10 = vpop.eup %3612 }
0x1ef7   :  { %v3615_v11 = vpop.eup %3614  ;;  %v2739_v13 = vmul.f32 %v3613_v10, %v2723_v56 }
0x1ef8   :  { %v2738_v14 = vmul.f32 %v3615_v11, %v2722_v57 }
0x1ef9   :  { %v2747_v16 = vmul.f32 %v2962_v12, %v2739_v13 }
0x1efa   :  { %v2746_v17 = vmul.f32 %v2962_v12, %v2738_v14 }
0x1efb   :  { %v2755_v19 = vadd.f32 %v2963_v15, %v2747_v16 }
0x1efc   :  { %v2754_v18 = vadd.f32 %v2963_v15, %v2746_v17 }
0x1efe   :  { %3380 = vmatprep.mubr.msk.f32.mxu0 %vm190_vm5, %v2754_v18 }
0x1eff   :  { %3381 = vmatmul.mubr.msk.f32.vlgmr.msra.gmra.mrb[30].mxu0 %vm190_vm5, %v2755_v19 }
0x1fd2   :  { %v3382_v21 = vpop.f32.mrb[30].mxu0 }
0x1fd3   :  { %v2845_v22 = vadd.f32 %v3382_v21, %v2964_v20  ;;  %v2839_v23 = vpop.f32.mrb[31].mxu0 }
0x1fd4   :  { %v2840_v26 = vadd.f32 %v2964_v20, %v2839_v23 }
0x1fd5   :  { %2849 = vst.msk [vmem:[#allocation2 + $0x8] sm:$0xff] %vm92_vm3, %v2845_v22 }
0x1fd6   :  { %2848 = vst.msk [vmem:[#allocation2] sm:$0xff] %vm92_vm3, %v2840_v26 }
0x1fd7   :  { %3627 = shalt.err (!%p3624_p4)
}
0x1fd8   :  { %s3628_s9 = scalar_lea.hbm %s4359_s25, 256 }
0x1fd9   :  { %p3629_p5 = scmp.ne.s32.totalorder %s4359_s25, %s3628_s9  ;;  %p3632_p6 = scmp.lt.u32.totalorder %s3628_s9, %s4359_s25 }
0x1fdb   :  { %p3634_p7 = pnand %p3632_p6, %p3629_p5 }
0x1fdd   :  { %3637 = shalt.err (!%p3634_p7)
}
0x1fde   :  { %s3651_s29 = smov 128   ;;  %s3652_s16 = smov 8  }
0x1fdf   :  { %2861 = dma.vmem_to_hbm [thread:$0]  %s2856_s17, 256, %s4359_s25, [#allocation3], %s3651_s29, %s3651_s29, %s3652_s16  }
0x1fe0   :  { %3638 = dma.done.wait [#allocation3], 256  }
0x1fe1   :  { %3639 = vsyncadd [#allocation3], 4294967040 }
0x1fe2   :  { %2865 = vsyncpa [#allocation3], 1 }

</bundles_post_ra>
